<compile_context>
chip_gen: v7x
topology: tpu7x:2x2x1
jax: 0.10.0
libtpu: 0.0.40
codegen_flags: <defaults>
</compile_context>

<pallas_src>
import math
import functools

import jax
import jax.numpy as jnp
from jax.experimental import pallas as pl
from jax.experimental.pallas import tpu as pltpu


# ----------------------------------------------------------------------------
# Fused Pallas kernel:
#   in-kernel EMA of momentum params  ->  2x batched encoder+head passes
#   ->  2x batched NTXent groups  ->  scalar total loss (SMEM)
# ----------------------------------------------------------------------------
def _fused_contrastive_kernel(x_ref, we_ref, be_ref, w1_ref, b1_ref, w2_ref, b2_ref, bank_ref,
                              loss_ref, we_o_ref, be_o_ref, w1_o_ref, b1_o_ref, w2_o_ref, b2_o_ref,
                              *, inv_t, ema_m, inv_b):
    """Stacked-branch forward.

    x_ref    : (6, B, din)     inputs  [q_road1, q_road2, q_cell, k_road1, k_road2, k_cell]
    we_ref   : (6, din, nemb)  encoder weights   (rows 0..2 online, 3..5 momentum copies)
    be_ref   : (6, 1,  nemb)   encoder biases
    w1_ref   : (6, nemb, nemb) projection-head layer-1 weights
    b1_ref   : (6, 1,  nemb)   projection-head layer-1 biases
    w2_ref   : (6, nemb, nout) projection-head layer-2 weights
    b2_ref   : (6, 1,  nout)   projection-head layer-2 biases
    bank_ref : (5, nout, Q)    memory banks [road1, road2, cell, inter1, inter2]
    loss_ref : (1,)  SMEM      total loss
    *_o_ref  : same shapes as the corresponding param stacks, aliased in place
               (online rows copied through, momentum rows EMA-updated).
    """

    # ---- lightly update_momentum EMA, done in-register; write back via the aliased outputs ---
    def split_ema(ref, out_ref):
        s = ref[...]
        online = s[0:3]
        mmt = s[3:6] * ema_m + online * (1.0 - ema_m)
        out_ref[0:3] = online          # online rows unchanged
        out_ref[3:6] = mmt             # momentum rows updated in place (input_output_aliases)
        return online, mmt

    we_q, we_k = split_ema(we_ref, we_o_ref)
    be_q, be_k = split_ema(be_ref, be_o_ref)
    w1_q, w1_k = split_ema(w1_ref, w1_o_ref)
    b1_q, b1_k = split_ema(b1_ref, b1_o_ref)
    w2_q, w2_k = split_ema(w2_ref, w2_o_ref)
    b2_q, b2_k = split_ema(b2_ref, b2_o_ref)

    x = x_ref[...]
    x_q, x_k = x[0:3], x[3:6]

    # ---- encoder Linear -> (Linear -> ReLU -> Linear) head, batched over the 3 branches ------
    def branch(xv, we, be, w1, b1, w2, b2):
        e = jnp.einsum('pbd,pde->pbe', xv, we, preferred_element_type=jnp.float32) + be
        h = jnp.maximum(
            jnp.einsum('pbd,pde->pbe', e, w1, preferred_element_type=jnp.float32) + b1, 0.0)
        p = jnp.einsum('pbd,pde->pbe', h, w2, preferred_element_type=jnp.float32) + b2
        # F.normalize(dim=-1, eps=1e-12) == p * rsqrt(max(|p|^2, eps^2)) : single EUP op
        return p * jax.lax.rsqrt(jnp.maximum(jnp.sum(p * p, axis=-1, keepdims=True), 1e-24))

    qn = branch(x_q, we_q, be_q, w1_q, b1_q, w2_q, b2_q)   # (3, B, nout) online  [road1, road2, cell]
    kn = branch(x_k, we_k, be_k, w1_k, b1_k, w2_k, b2_k)   # (3, B, nout) momentum keys
    # TODO(synk): momentum (k) branch is .detach() in PyTorch; a custom_vjp is needed before
    #             jax.grad can flow through this fused kernel for training.

    bank = bank_ref[...]

    # ---- NTXentLoss with memory-bank negatives, batched per group (labels == 0 -> positive) --
    def ntxent_group_sum(q, k, banks):
        pos = jnp.sum(q * k, axis=-1, keepdims=True) * inv_t                                   # (g,B,1)
        neg = jnp.einsum('pbd,pdq->pbq', q, banks, preferred_element_type=jnp.float32) * inv_t  # (g,B,Q)
        m = jnp.maximum(pos, jnp.max(neg, axis=-1, keepdims=True))
        lse = m + jnp.log(jnp.exp(pos - m) + jnp.sum(jnp.exp(neg - m), axis=-1, keepdims=True))
        return jnp.sum(lse - pos)   # sum over group and batch; divided by B at the end

    # intra: (q_road1,k_road1,bank_road1), (q_road2,k_road2,bank_road2), (q_cell,k_cell,bank_cell)
    total = ntxent_group_sum(qn, kn, bank[0:3])
    # inter: (q_road1,k_road2,bank_inter1), (q_road2,k_cell,bank_inter2)
    total = total + ntxent_group_sum(qn[0:2], kn[1:3], bank[3:5])

    loss_ref[0] = total * inv_b      # sum of the five per-loss batch means


def fused_contrastive(params, bank_stack, x_stack, *, momentum, temperature):
    """Single pallas_call for the whole step.  Returns (scalar loss, updated param stacks)."""
    B = x_stack.shape[1]
    vmem = pl.BlockSpec(memory_space=pltpu.MemorySpace.VMEM)
    smem = pl.BlockSpec(memory_space=pltpu.MemorySpace.SMEM)

    out_shape = (
        jax.ShapeDtypeStruct((1,), jnp.float32),
        jax.ShapeDtypeStruct(params["we"].shape, params["we"].dtype),
        jax.ShapeDtypeStruct(params["be"].shape, params["be"].dtype),
        jax.ShapeDtypeStruct(params["w1"].shape, params["w1"].dtype),
        jax.ShapeDtypeStruct(params["b1"].shape, params["b1"].dtype),
        jax.ShapeDtypeStruct(params["w2"].shape, params["w2"].dtype),
        jax.ShapeDtypeStruct(params["b2"].shape, params["b2"].dtype),
    )
    outs = pl.pallas_call(
        functools.partial(_fused_contrastive_kernel,
                          inv_t=1.0 / temperature, ema_m=momentum, inv_b=1.0 / B),
        out_shape=out_shape,
        in_specs=[vmem] * 8,
        out_specs=(smem,) + (vmem,) * 6,
        # param stacks are updated in place (EMA writeback)
        input_output_aliases={1: 1, 2: 2, 3: 3, 4: 4, 5: 5, 6: 6},
    )(x_stack, params["we"], params["be"], params["w1"], params["b1"],
      params["w2"], params["b2"], bank_stack)

    loss = outs[0][0]
    new_params = {"we": outs[1], "be": outs[2], "w1": outs[3],
                  "b1": outs[4], "w2": outs[5], "b2": outs[6]}
    return loss, new_params


@functools.partial(jax.jit, static_argnames=("mmt", "temperature"))
def intra_inter_contrastive_forward(params, bank_stack, x_stack, mmt=0.999, temperature=0.07):
    """Jitted step: exactly one XLA op (the fused pallas_call)."""
    momentum = cosine_schedule(1, 10, mmt, 1.0)   # python float, folded at trace time
    return fused_contrastive(params, bank_stack, x_stack,
                             momentum=momentum, temperature=temperature)


# ----------------------------------------------------------------------------
# One-time init: parameters / banks stacked ONCE (never re-stacked per step)
# ----------------------------------------------------------------------------
def cosine_schedule(step, max_steps, start_value, end_value):
    if max_steps == 1:
        return end_value
    return end_value - (end_value - start_value) * (math.cos(math.pi * step / (max_steps - 1)) + 1.0) / 2.0


def init_linear(key, din, dout):
    """nn.Linear-style init: U(-1/sqrt(din), 1/sqrt(din)); bias stored as (1, dout)."""
    kw, kb = jax.random.split(key)
    bound = 1.0 / math.sqrt(din)
    w = jax.random.uniform(kw, (din, dout), jnp.float32, -bound, bound)
    b = jax.random.uniform(kb, (1, dout), jnp.float32, -bound, bound)
    return w, b


def init_branch(key, din, nemb, nout):
    k0, k1, k2 = jax.random.split(key, 3)
    we, be = init_linear(k0, din, nemb)      # encoder
    w1, b1 = init_linear(k1, nemb, nemb)     # projection head layer 1
    w2, b2 = init_linear(k2, nemb, nout)     # projection head layer 2
    return (we, be, w1, b1, w2, b2)


def init_memory_bank(key, dim, size):
    """lightly MemoryBankModule first-call init: randn(dim, size) normalized along dim=0."""
    bank = jax.random.normal(key, (dim, size), jnp.float32)
    return bank / jnp.maximum(jnp.linalg.norm(bank, axis=0, keepdims=True), 1e-12)


def init_intra_inter_contrastive(key, din, nemb, nout, queue_size):
    """Build the (6, ...) parameter stacks (rows 0..2 online, 3..5 momentum deep copies) and the
    (5, nout, Q) bank stack.  This stacking happens exactly once, at init time.
    Note: stacking requires road1_nemb == road2_nemb == cell_nemb (as in the demo)."""
    k_par, k_bank = jax.random.split(key)
    kr1, kr2, kc = jax.random.split(k_par, 3)
    online = [init_branch(kr1, din, nemb, nout),
              init_branch(kr2, din, nemb, nout),
              init_branch(kc, din, nemb, nout)]
    branches = online + online   # momentum branches = deep copies of the online branches
    params = {
        "we": jnp.stack([b[0] for b in branches]),   # (6, din, nemb)
        "be": jnp.stack([b[1] for b in branches]),   # (6, 1, nemb)
        "w1": jnp.stack([b[2] for b in branches]),   # (6, nemb, nemb)
        "b1": jnp.stack([b[3] for b in branches]),   # (6, 1, nemb)
        "w2": jnp.stack([b[4] for b in branches]),   # (6, nemb, nout)
        "b2": jnp.stack([b[5] for b in branches]),   # (6, 1, nout)
    }
    kbs = jax.random.split(k_bank, 5)
    bank_stack = jnp.stack([init_memory_bank(k, nout, queue_size) for k in kbs])  # (5, nout, Q)
    # TODO(synk): memory-bank dequeue/enqueue of keys is stateful training bookkeeping;
    #             only the first-call semantics (random normalized bank as negatives) is reproduced.
    return params, bank_stack


# ----------------------------------------------------------------------------
# Main
# ----------------------------------------------------------------------------
if __name__ == "__main__":
    B = 8
    din = 32
    nemb = 32          # road1_nemb = road2_nemb = cell_nemb
    nout = 16
    queue_size = 64
    mmt = 0.999
    temperature = 0.07

    root = jax.random.PRNGKey(0)
    k_model, k_in = jax.random.split(root)

    params, bank_stack = init_intra_inter_contrastive(k_model, din, nemb, nout, queue_size)

    ki = jax.random.split(k_in, 6)
    x_q_road1 = jax.random.normal(ki[0], (B, din), jnp.float32)
    x_k_road1 = jax.random.normal(ki[1], (B, din), jnp.float32)
    x_q_road2 = jax.random.normal(ki[2], (B, din), jnp.float32)
    x_k_road2 = jax.random.normal(ki[3], (B, din), jnp.float32)
    x_q_cell = jax.random.normal(ki[4], (B, din), jnp.float32)
    x_k_cell = jax.random.normal(ki[5], (B, din), jnp.float32)

    # Input stack (built once, outside the jitted step): online passes first, momentum passes last.
    x_stack = jnp.stack([x_q_road1, x_q_road2, x_q_cell,
                         x_k_road1, x_k_road2, x_k_cell])   # (6, B, din)

    loss, new_params = intra_inter_contrastive_forward(
        params, bank_stack, x_stack, mmt=mmt, temperature=temperature)
    loss = jax.block_until_ready(loss)
    jax.block_until_ready(new_params)

    assert loss.shape == () and jnp.isfinite(loss)
    print("KERNEL_OK")
</pallas_src>

<mosaic_0001>
module attributes {stable_mosaic.version = 11 : i64} {
  func.func @_fused_contrastive_kernel(%arg0: memref<6x8x32xf32, #tpu.memory_space<vmem>>, %arg1: memref<6x32x32xf32, #tpu.memory_space<vmem>>, %arg2: memref<6x1x32xf32, #tpu.memory_space<vmem>>, %arg3: memref<6x32x32xf32, #tpu.memory_space<vmem>>, %arg4: memref<6x1x32xf32, #tpu.memory_space<vmem>>, %arg5: memref<6x32x16xf32, #tpu.memory_space<vmem>>, %arg6: memref<6x1x16xf32, #tpu.memory_space<vmem>>, %arg7: memref<5x16x64xf32, #tpu.memory_space<vmem>>, %arg8: memref<1xf32, #tpu.memory_space<smem>>, %arg9: memref<6x32x32xf32, #tpu.memory_space<vmem>>, %arg10: memref<6x1x32xf32, #tpu.memory_space<vmem>>, %arg11: memref<6x32x32xf32, #tpu.memory_space<vmem>>, %arg12: memref<6x1x32xf32, #tpu.memory_space<vmem>>, %arg13: memref<6x32x16xf32, #tpu.memory_space<vmem>>, %arg14: memref<6x1x16xf32, #tpu.memory_space<vmem>>) attributes {dimension_semantics = [], scalar_prefetch = 0 : i64, scratch_operands = 0 : i64, tpu.core_type = #tpu.core_type<tc>} {
    %c0 = arith.constant 0 : index
    %c0_0 = arith.constant 0 : index
    %c0_1 = arith.constant 0 : index
    %0 = vector.load %arg1[%c0, %c0_0, %c0_1] : memref<6x32x32xf32, #tpu.memory_space<vmem>>, vector<6x32x32xf32>
    %1 = vector.extract_strided_slice %0 {offsets = [0, 0, 0], sizes = [3, 32, 32], strides = [1, 1, 1]} : vector<6x32x32xf32> to vector<3x32x32xf32>
    %2 = vector.extract_strided_slice %0 {offsets = [3, 0, 0], sizes = [3, 32, 32], strides = [1, 1, 1]} : vector<6x32x32xf32> to vector<3x32x32xf32>
    %cst = arith.constant 0.999030172 : f32
    %3 = vector.broadcast %cst : f32 to vector<3x32x32xf32>
    %4 = arith.mulf %2, %3 : vector<3x32x32xf32>
    %cst_2 = arith.constant 9.69846325E-4 : f32
    %5 = vector.broadcast %cst_2 : f32 to vector<3x32x32xf32>
    %6 = arith.mulf %1, %5 : vector<3x32x32xf32>
    %7 = arith.addf %4, %6 : vector<3x32x32xf32>
    %c0_3 = arith.constant 0 : index
    %c0_4 = arith.constant 0 : index
    %c0_5 = arith.constant 0 : index
    %8 = vector.load %arg9[%c0_3, %c0_4, %c0_5] : memref<6x32x32xf32, #tpu.memory_space<vmem>>, vector<3x32x32xf32>
    tpu.vector_store %arg9[%c0_3, %c0_4, %c0_5], %1 {strides = array<i32>} : memref<6x32x32xf32, #tpu.memory_space<vmem>>, vector<3x32x32xf32>,
    %c3 = arith.constant 3 : index
    %c0_6 = arith.constant 0 : index
    %c0_7 = arith.constant 0 : index
    %9 = vector.load %arg9[%c3, %c0_6, %c0_7] : memref<6x32x32xf32, #tpu.memory_space<vmem>>, vector<3x32x32xf32>
    tpu.vector_store %arg9[%c3, %c0_6, %c0_7], %7 {strides = array<i32>} : memref<6x32x32xf32, #tpu.memory_space<vmem>>, vector<3x32x32xf32>,
    %c0_8 = arith.constant 0 : index
    %c0_9 = arith.constant 0 : index
    %c0_10 = arith.constant 0 : index
    %10 = vector.load %arg2[%c0_8, %c0_9, %c0_10] : memref<6x1x32xf32, #tpu.memory_space<vmem>>, vector<6x1x32xf32>
    %11 = vector.extract_strided_slice %10 {offsets = [0, 0, 0], sizes = [3, 1, 32], strides = [1, 1, 1]} : vector<6x1x32xf32> to vector<3x1x32xf32>
    %12 = vector.extract_strided_slice %10 {offsets = [3, 0, 0], sizes = [3, 1, 32], strides = [1, 1, 1]} : vector<6x1x32xf32> to vector<3x1x32xf32>
    %cst_11 = arith.constant 0.999030172 : f32
    %13 = vector.broadcast %cst_11 : f32 to vector<3x1x32xf32>
    %14 = arith.mulf %12, %13 : vector<3x1x32xf32>
    %cst_12 = arith.constant 9.69846325E-4 : f32
    %15 = vector.broadcast %cst_12 : f32 to vector<3x1x32xf32>
    %16 = arith.mulf %11, %15 : vector<3x1x32xf32>
    %17 = arith.addf %14, %16 : vector<3x1x32xf32>
    %c0_13 = arith.constant 0 : index
    %c0_14 = arith.constant 0 : index
    %c0_15 = arith.constant 0 : index
    %18 = vector.load %arg10[%c0_13, %c0_14, %c0_15] : memref<6x1x32xf32, #tpu.memory_space<vmem>>, vector<3x1x32xf32>
    tpu.vector_store %arg10[%c0_13, %c0_14, %c0_15], %11 {strides = array<i32>} : memref<6x1x32xf32, #tpu.memory_space<vmem>>, vector<3x1x32xf32>,
    %c3_16 = arith.constant 3 : index
    %c0_17 = arith.constant 0 : index
    %c0_18 = arith.constant 0 : index
    %19 = vector.load %arg10[%c3_16, %c0_17, %c0_18] : memref<6x1x32xf32, #tpu.memory_space<vmem>>, vector<3x1x32xf32>
    tpu.vector_store %arg10[%c3_16, %c0_17, %c0_18], %17 {strides = array<i32>} : memref<6x1x32xf32, #tpu.memory_space<vmem>>, vector<3x1x32xf32>,
    %c0_19 = arith.constant 0 : index
    %c0_20 = arith.constant 0 : index
    %c0_21 = arith.constant 0 : index
    %20 = vector.load %arg3[%c0_19, %c0_20, %c0_21] : memref<6x32x32xf32, #tpu.memory_space<vmem>>, vector<6x32x32xf32>
    %21 = vector.extract_strided_slice %20 {offsets = [0, 0, 0], sizes = [3, 32, 32], strides = [1, 1, 1]} : vector<6x32x32xf32> to vector<3x32x32xf32>
    %22 = vector.extract_strided_slice %20 {offsets = [3, 0, 0], sizes = [3, 32, 32], strides = [1, 1, 1]} : vector<6x32x32xf32> to vector<3x32x32xf32>
    %cst_22 = arith.constant 0.999030172 : f32
    %23 = vector.broadcast %cst_22 : f32 to vector<3x32x32xf32>
    %24 = arith.mulf %22, %23 : vector<3x32x32xf32>
    %cst_23 = arith.constant 9.69846325E-4 : f32
    %25 = vector.broadcast %cst_23 : f32 to vector<3x32x32xf32>
    %26 = arith.mulf %21, %25 : vector<3x32x32xf32>
    %27 = arith.addf %24, %26 : vector<3x32x32xf32>
    %c0_24 = arith.constant 0 : index
    %c0_25 = arith.constant 0 : index
    %c0_26 = arith.constant 0 : index
    %28 = vector.load %arg11[%c0_24, %c0_25, %c0_26] : memref<6x32x32xf32, #tpu.memory_space<vmem>>, vector<3x32x32xf32>
    tpu.vector_store %arg11[%c0_24, %c0_25, %c0_26], %21 {strides = array<i32>} : memref<6x32x32xf32, #tpu.memory_space<vmem>>, vector<3x32x32xf32>,
    %c3_27 = arith.constant 3 : index
    %c0_28 = arith.constant 0 : index
    %c0_29 = arith.constant 0 : index
    %29 = vector.load %arg11[%c3_27, %c0_28, %c0_29] : memref<6x32x32xf32, #tpu.memory_space<vmem>>, vector<3x32x32xf32>
    tpu.vector_store %arg11[%c3_27, %c0_28, %c0_29], %27 {strides = array<i32>} : memref<6x32x32xf32, #tpu.memory_space<vmem>>, vector<3x32x32xf32>,
    %c0_30 = arith.constant 0 : index
    %c0_31 = arith.constant 0 : index
    %c0_32 = arith.constant 0 : index
    %30 = vector.load %arg4[%c0_30, %c0_31, %c0_32] : memref<6x1x32xf32, #tpu.memory_space<vmem>>, vector<6x1x32xf32>
    %31 = vector.extract_strided_slice %30 {offsets = [0, 0, 0], sizes = [3, 1, 32], strides = [1, 1, 1]} : vector<6x1x32xf32> to vector<3x1x32xf32>
    %32 = vector.extract_strided_slice %30 {offsets = [3, 0, 0], sizes = [3, 1, 32], strides = [1, 1, 1]} : vector<6x1x32xf32> to vector<3x1x32xf32>
    %cst_33 = arith.constant 0.999030172 : f32
    %33 = vector.broadcast %cst_33 : f32 to vector<3x1x32xf32>
    %34 = arith.mulf %32, %33 : vector<3x1x32xf32>
    %cst_34 = arith.constant 9.69846325E-4 : f32
    %35 = vector.broadcast %cst_34 : f32 to vector<3x1x32xf32>
    %36 = arith.mulf %31, %35 : vector<3x1x32xf32>
    %37 = arith.addf %34, %36 : vector<3x1x32xf32>
    %c0_35 = arith.constant 0 : index
    %c0_36 = arith.constant 0 : index
    %c0_37 = arith.constant 0 : index
    %38 = vector.load %arg12[%c0_35, %c0_36, %c0_37] : memref<6x1x32xf32, #tpu.memory_space<vmem>>, vector<3x1x32xf32>
    tpu.vector_store %arg12[%c0_35, %c0_36, %c0_37], %31 {strides = array<i32>} : memref<6x1x32xf32, #tpu.memory_space<vmem>>, vector<3x1x32xf32>,
    %c3_38 = arith.constant 3 : index
    %c0_39 = arith.constant 0 : index
    %c0_40 = arith.constant 0 : index
    %39 = vector.load %arg12[%c3_38, %c0_39, %c0_40] : memref<6x1x32xf32, #tpu.memory_space<vmem>>, vector<3x1x32xf32>
    tpu.vector_store %arg12[%c3_38, %c0_39, %c0_40], %37 {strides = array<i32>} : memref<6x1x32xf32, #tpu.memory_space<vmem>>, vector<3x1x32xf32>,
    %c0_41 = arith.constant 0 : index
    %c0_42 = arith.constant 0 : index
    %c0_43 = arith.constant 0 : index
    %40 = vector.load %arg5[%c0_41, %c0_42, %c0_43] : memref<6x32x16xf32, #tpu.memory_space<vmem>>, vector<6x32x16xf32>
    %41 = vector.extract_strided_slice %40 {offsets = [0, 0, 0], sizes = [3, 32, 16], strides = [1, 1, 1]} : vector<6x32x16xf32> to vector<3x32x16xf32>
    %42 = vector.extract_strided_slice %40 {offsets = [3, 0, 0], sizes = [3, 32, 16], strides = [1, 1, 1]} : vector<6x32x16xf32> to vector<3x32x16xf32>
    %cst_44 = arith.constant 0.999030172 : f32
    %43 = vector.broadcast %cst_44 : f32 to vector<3x32x16xf32>
    %44 = arith.mulf %42, %43 : vector<3x32x16xf32>
    %cst_45 = arith.constant 9.69846325E-4 : f32
    %45 = vector.broadcast %cst_45 : f32 to vector<3x32x16xf32>
    %46 = arith.mulf %41, %45 : vector<3x32x16xf32>
    %47 = arith.addf %44, %46 : vector<3x32x16xf32>
    %c0_46 = arith.constant 0 : index
    %c0_47 = arith.constant 0 : index
    %c0_48 = arith.constant 0 : index
    %48 = vector.load %arg13[%c0_46, %c0_47, %c0_48] : memref<6x32x16xf32, #tpu.memory_space<vmem>>, vector<3x32x16xf32>
    tpu.vector_store %arg13[%c0_46, %c0_47, %c0_48], %41 {strides = array<i32>} : memref<6x32x16xf32, #tpu.memory_space<vmem>>, vector<3x32x16xf32>,
    %c3_49 = arith.constant 3 : index
    %c0_50 = arith.constant 0 : index
    %c0_51 = arith.constant 0 : index
    %49 = vector.load %arg13[%c3_49, %c0_50, %c0_51] : memref<6x32x16xf32, #tpu.memory_space<vmem>>, vector<3x32x16xf32>
    tpu.vector_store %arg13[%c3_49, %c0_50, %c0_51], %47 {strides = array<i32>} : memref<6x32x16xf32, #tpu.memory_space<vmem>>, vector<3x32x16xf32>,
    %c0_52 = arith.constant 0 : index
    %c0_53 = arith.constant 0 : index
    %c0_54 = arith.constant 0 : index
    %50 = vector.load %arg6[%c0_52, %c0_53, %c0_54] : memref<6x1x16xf32, #tpu.memory_space<vmem>>, vector<6x1x16xf32>
    %51 = vector.extract_strided_slice %50 {offsets = [0, 0, 0], sizes = [3, 1, 16], strides = [1, 1, 1]} : vector<6x1x16xf32> to vector<3x1x16xf32>
    %52 = vector.extract_strided_slice %50 {offsets = [3, 0, 0], sizes = [3, 1, 16], strides = [1, 1, 1]} : vector<6x1x16xf32> to vector<3x1x16xf32>
    %cst_55 = arith.constant 0.999030172 : f32
    %53 = vector.broadcast %cst_55 : f32 to vector<3x1x16xf32>
    %54 = arith.mulf %52, %53 : vector<3x1x16xf32>
    %cst_56 = arith.constant 9.69846325E-4 : f32
    %55 = vector.broadcast %cst_56 : f32 to vector<3x1x16xf32>
    %56 = arith.mulf %51, %55 : vector<3x1x16xf32>
    %57 = arith.addf %54, %56 : vector<3x1x16xf32>
    %c0_57 = arith.constant 0 : index
    %c0_58 = arith.constant 0 : index
    %c0_59 = arith.constant 0 : index
    %58 = vector.load %arg14[%c0_57, %c0_58, %c0_59] : memref<6x1x16xf32, #tpu.memory_space<vmem>>, vector<3x1x16xf32>
    tpu.vector_store %arg14[%c0_57, %c0_58, %c0_59], %51 {strides = array<i32>} : memref<6x1x16xf32, #tpu.memory_space<vmem>>, vector<3x1x16xf32>,
    %c3_60 = arith.constant 3 : index
    %c0_61 = arith.constant 0 : index
    %c0_62 = arith.constant 0 : index
    %59 = vector.load %arg14[%c3_60, %c0_61, %c0_62] : memref<6x1x16xf32, #tpu.memory_space<vmem>>, vector<3x1x16xf32>
    tpu.vector_store %arg14[%c3_60, %c0_61, %c0_62], %57 {strides = array<i32>} : memref<6x1x16xf32, #tpu.memory_space<vmem>>, vector<3x1x16xf32>,
    %c0_63 = arith.constant 0 : index
    %c0_64 = arith.constant 0 : index
    %c0_65 = arith.constant 0 : index
    %60 = vector.load %arg0[%c0_63, %c0_64, %c0_65] : memref<6x8x32xf32, #tpu.memory_space<vmem>>, vector<6x8x32xf32>
    %61 = vector.extract_strided_slice %60 {offsets = [0, 0, 0], sizes = [3, 8, 32], strides = [1, 1, 1]} : vector<6x8x32xf32> to vector<3x8x32xf32>
    %62 = vector.extract_strided_slice %60 {offsets = [3, 0, 0], sizes = [3, 8, 32], strides = [1, 1, 1]} : vector<6x8x32xf32> to vector<3x8x32xf32>
    "tpu.trace_start"() <{level = 10 : i32, message = "pbd,pde->pbe"}> : () -> ()
    %cst_66 = arith.constant dense<0.000000e+00> : vector<3x8x32xf32>
    %63 = tpu.matmul %61, %1, %cst_66 {dimension_numbers = #tpu.dot_dimension_numbers<[2], [1], [1], [2], [0, 0, 0, 1, 1, 2], [0], [0]>} : vector<3x8x32xf32>, vector<3x32x32xf32>, vector<3x8x32xf32> -> vector<3x8x32xf32>
    "tpu.trace_stop"() : () -> ()
    %64 = vector.broadcast %11 : vector<3x1x32xf32> to vector<3x8x32xf32>
    %65 = arith.addf %63, %64 : vector<3x8x32xf32>
    "tpu.trace_start"() <{level = 10 : i32, message = "pbd,pde->pbe"}> : () -> ()
    %cst_67 = arith.constant dense<0.000000e+00> : vector<3x8x32xf32>
    %66 = tpu.matmul %65, %21, %cst_67 {dimension_numbers = #tpu.dot_dimension_numbers<[2], [1], [1], [2], [0, 0, 0, 1, 1, 2], [0], [0]>} : vector<3x8x32xf32>, vector<3x32x32xf32>, vector<3x8x32xf32> -> vector<3x8x32xf32>
    "tpu.trace_stop"() : () -> ()
    %67 = vector.broadcast %31 : vector<3x1x32xf32> to vector<3x8x32xf32>
    %68 = arith.addf %66, %67 : vector<3x8x32xf32>
    %cst_68 = arith.constant 0.000000e+00 : f32
    %69 = vector.broadcast %cst_68 : f32 to vector<3x8x32xf32>
    %70 = arith.maximumf %68, %69 : vector<3x8x32xf32>
    "tpu.trace_start"() <{level = 10 : i32, message = "pbd,pde->pbe"}> : () -> ()
    %cst_69 = arith.constant dense<0.000000e+00> : vector<3x8x16xf32>
    %71 = tpu.matmul %70, %41, %cst_69 {dimension_numbers = #tpu.dot_dimension_numbers<[2], [1], [1], [2], [0, 0, 0, 1, 1, 2], [0], [0]>} : vector<3x8x32xf32>, vector<3x32x16xf32>, vector<3x8x16xf32> -> vector<3x8x16xf32>
    "tpu.trace_stop"() : () -> ()
    %72 = vector.broadcast %51 : vector<3x1x16xf32> to vector<3x8x16xf32>
    %73 = arith.addf %71, %72 : vector<3x8x16xf32>
    %74 = arith.mulf %73, %73 : vector<3x8x16xf32>
    %cst_70 = arith.constant dense<0.000000e+00> : vector<3x8xf32>
    %75 = vector.multi_reduction <add>, %74, %cst_70 [2] : vector<3x8x16xf32> to vector<3x8xf32>
    %76 = vector.shape_cast %75 : vector<3x8xf32> to vector<3x8x1xf32>
    %cst_71 = arith.constant 1.000000e-24 : f32
    %77 = vector.broadcast %cst_71 : f32 to vector<3x8x1xf32>
    %78 = arith.maximumf %76, %77 : vector<3x8x1xf32>
    %79 = math.rsqrt %78 : vector<3x8x1xf32>
    %80 = vector.broadcast %79 : vector<3x8x1xf32> to vector<3x8x16xf32>
    %81 = arith.mulf %73, %80 : vector<3x8x16xf32>
    "tpu.trace_start"() <{level = 10 : i32, message = "pbd,pde->pbe"}> : () -> ()
    %cst_72 = arith.constant dense<0.000000e+00> : vector<3x8x32xf32>
    %82 = tpu.matmul %62, %7, %cst_72 {dimension_numbers = #tpu.dot_dimension_numbers<[2], [1], [1], [2], [0, 0, 0, 1, 1, 2], [0], [0]>} : vector<3x8x32xf32>, vector<3x32x32xf32>, vector<3x8x32xf32> -> vector<3x8x32xf32>
    "tpu.trace_stop"() : () -> ()
    %83 = vector.broadcast %17 : vector<3x1x32xf32> to vector<3x8x32xf32>
    %84 = arith.addf %82, %83 : vector<3x8x32xf32>
    "tpu.trace_start"() <{level = 10 : i32, message = "pbd,pde->pbe"}> : () -> ()
    %cst_73 = arith.constant dense<0.000000e+00> : vector<3x8x32xf32>
    %85 = tpu.matmul %84, %27, %cst_73 {dimension_numbers = #tpu.dot_dimension_numbers<[2], [1], [1], [2], [0, 0, 0, 1, 1, 2], [0], [0]>} : vector<3x8x32xf32>, vector<3x32x32xf32>, vector<3x8x32xf32> -> vector<3x8x32xf32>
    "tpu.trace_stop"() : () -> ()
    %86 = vector.broadcast %37 : vector<3x1x32xf32> to vector<3x8x32xf32>
    %87 = arith.addf %85, %86 : vector<3x8x32xf32>
    %cst_74 = arith.constant 0.000000e+00 : f32
    %88 = vector.broadcast %cst_74 : f32 to vector<3x8x32xf32>
    %89 = arith.maximumf %87, %88 : vector<3x8x32xf32>
    "tpu.trace_start"() <{level = 10 : i32, message = "pbd,pde->pbe"}> : () -> ()
    %cst_75 = arith.constant dense<0.000000e+00> : vector<3x8x16xf32>
    %90 = tpu.matmul %89, %47, %cst_75 {dimension_numbers = #tpu.dot_dimension_numbers<[2], [1], [1], [2], [0, 0, 0, 1, 1, 2], [0], [0]>} : vector<3x8x32xf32>, vector<3x32x16xf32>, vector<3x8x16xf32> -> vector<3x8x16xf32>
    "tpu.trace_stop"() : () -> ()
    %91 = vector.broadcast %57 : vector<3x1x16xf32> to vector<3x8x16xf32>
    %92 = arith.addf %90, %91 : vector<3x8x16xf32>
    %93 = arith.mulf %92, %92 : vector<3x8x16xf32>
    %cst_76 = arith.constant dense<0.000000e+00> : vector<3x8xf32>
    %94 = vector.multi_reduction <add>, %93, %cst_76 [2] : vector<3x8x16xf32> to vector<3x8xf32>
    %95 = vector.shape_cast %94 : vector<3x8xf32> to vector<3x8x1xf32>
    %cst_77 = arith.constant 1.000000e-24 : f32
    %96 = vector.broadcast %cst_77 : f32 to vector<3x8x1xf32>
    %97 = arith.maximumf %95, %96 : vector<3x8x1xf32>
    %98 = math.rsqrt %97 : vector<3x8x1xf32>
    %99 = vector.broadcast %98 : vector<3x8x1xf32> to vector<3x8x16xf32>
    %100 = arith.mulf %92, %99 : vector<3x8x16xf32>
    %c0_78 = arith.constant 0 : index
    %c0_79 = arith.constant 0 : index
    %c0_80 = arith.constant 0 : index
    %101 = vector.load %arg7[%c0_78, %c0_79, %c0_80] : memref<5x16x64xf32, #tpu.memory_space<vmem>>, vector<5x16x64xf32>
    %102 = vector.extract_strided_slice %101 {offsets = [0, 0, 0], sizes = [3, 16, 64], strides = [1, 1, 1]} : vector<5x16x64xf32> to vector<3x16x64xf32>
    %103 = arith.mulf %81, %100 : vector<3x8x16xf32>
    %cst_81 = arith.constant dense<0.000000e+00> : vector<3x8xf32>
    %104 = vector.multi_reduction <add>, %103, %cst_81 [2] : vector<3x8x16xf32> to vector<3x8xf32>
    %105 = vector.shape_cast %104 : vector<3x8xf32> to vector<3x8x1xf32>
    %cst_82 = arith.constant 14.2857141 : f32
    %106 = vector.broadcast %cst_82 : f32 to vector<3x8x1xf32>
    %107 = arith.mulf %105, %106 : vector<3x8x1xf32>
    "tpu.trace_start"() <{level = 10 : i32, message = "pbd,pdq->pbq"}> : () -> ()
    %cst_83 = arith.constant dense<0.000000e+00> : vector<3x8x64xf32>
    %108 = tpu.matmul %81, %102, %cst_83 {dimension_numbers = #tpu.dot_dimension_numbers<[2], [1], [1], [2], [0, 0, 0, 1, 1, 2], [0], [0]>} : vector<3x8x16xf32>, vector<3x16x64xf32>, vector<3x8x64xf32> -> vector<3x8x64xf32>
    "tpu.trace_stop"() : () -> ()
    %cst_84 = arith.constant 14.2857141 : f32
    %109 = vector.broadcast %cst_84 : f32 to vector<3x8x64xf32>
    %110 = arith.mulf %108, %109 : vector<3x8x64xf32>
    %cst_85 = arith.constant dense<0xFF800000> : vector<3x8xf32>
    %111 = vector.multi_reduction <maximumf>, %110, %cst_85 [2] : vector<3x8x64xf32> to vector<3x8xf32>
    %112 = vector.shape_cast %111 : vector<3x8xf32> to vector<3x8x1xf32>
    %113 = arith.maximumf %107, %112 : vector<3x8x1xf32>
    %114 = arith.subf %107, %113 : vector<3x8x1xf32>
    %115 = math.exp %114 : vector<3x8x1xf32>
    %116 = vector.broadcast %113 : vector<3x8x1xf32> to vector<3x8x64xf32>
    %117 = arith.subf %110, %116 : vector<3x8x64xf32>
    %118 = math.exp %117 : vector<3x8x64xf32>
    %cst_86 = arith.constant dense<0.000000e+00> : vector<3x8xf32>
    %119 = vector.multi_reduction <add>, %118, %cst_86 [2] : vector<3x8x64xf32> to vector<3x8xf32>
    %120 = vector.shape_cast %119 : vector<3x8xf32> to vector<3x8x1xf32>
    %121 = arith.addf %115, %120 : vector<3x8x1xf32>
    %122 = math.log %121 : vector<3x8x1xf32>
    %123 = arith.addf %113, %122 : vector<3x8x1xf32>
    %124 = arith.subf %123, %107 : vector<3x8x1xf32>
    %125 = vector.shape_cast %124 : vector<3x8x1xf32> to vector<1x3x8x1xf32>
    %cst_87 = arith.constant dense<0.000000e+00> : vector<1xf32>
    %126 = vector.multi_reduction <add>, %125, %cst_87 [1, 2, 3] : vector<1x3x8x1xf32> to vector<1xf32>
    %127 = vector.shape_cast %126 : vector<1xf32> to vector<1x1x1x1xf32>
    %128 = vector.extract %127[0, 0, 0, 0] : f32 from vector<1x1x1x1xf32>
    %129 = vector.extract_strided_slice %81 {offsets = [0, 0, 0], sizes = [2, 8, 16], strides = [1, 1, 1]} : vector<3x8x16xf32> to vector<2x8x16xf32>
    %130 = vector.extract_strided_slice %100 {offsets = [1, 0, 0], sizes = [2, 8, 16], strides = [1, 1, 1]} : vector<3x8x16xf32> to vector<2x8x16xf32>
    %131 = vector.extract_strided_slice %101 {offsets = [3, 0, 0], sizes = [2, 16, 64], strides = [1, 1, 1]} : vector<5x16x64xf32> to vector<2x16x64xf32>
    %132 = arith.mulf %129, %130 : vector<2x8x16xf32>
    %cst_88 = arith.constant dense<0.000000e+00> : vector<2x8xf32>
    %133 = vector.multi_reduction <add>, %132, %cst_88 [2] : vector<2x8x16xf32> to vector<2x8xf32>
    %134 = vector.shape_cast %133 : vector<2x8xf32> to vector<2x8x1xf32>
    %cst_89 = arith.constant 14.2857141 : f32
    %135 = vector.broadcast %cst_89 : f32 to vector<2x8x1xf32>
    %136 = arith.mulf %134, %135 : vector<2x8x1xf32>
    "tpu.trace_start"() <{level = 10 : i32, message = "pbd,pdq->pbq"}> : () -> ()
    %cst_90 = arith.constant dense<0.000000e+00> : vector<2x8x64xf32>
    %137 = tpu.matmul %129, %131, %cst_90 {dimension_numbers = #tpu.dot_dimension_numbers<[2], [1], [1], [2], [0, 0, 0, 1, 1, 2], [0], [0]>} : vector<2x8x16xf32>, vector<2x16x64xf32>, vector<2x8x64xf32> -> vector<2x8x64xf32>
    "tpu.trace_stop"() : () -> ()
    %cst_91 = arith.constant 14.2857141 : f32
    %138 = vector.broadcast %cst_91 : f32 to vector<2x8x64xf32>
    %139 = arith.mulf %137, %138 : vector<2x8x64xf32>
    %cst_92 = arith.constant dense<0xFF800000> : vector<2x8xf32>
    %140 = vector.multi_reduction <maximumf>, %139, %cst_92 [2] : vector<2x8x64xf32> to vector<2x8xf32>
    %141 = vector.shape_cast %140 : vector<2x8xf32> to vector<2x8x1xf32>
    %142 = arith.maximumf %136, %141 : vector<2x8x1xf32>
    %143 = arith.subf %136, %142 : vector<2x8x1xf32>
    %144 = math.exp %143 : vector<2x8x1xf32>
    %145 = vector.broadcast %142 : vector<2x8x1xf32> to vector<2x8x64xf32>
    %146 = arith.subf %139, %145 : vector<2x8x64xf32>
    %147 = math.exp %146 : vector<2x8x64xf32>
    %cst_93 = arith.constant dense<0.000000e+00> : vector<2x8xf32>
    %148 = vector.multi_reduction <add>, %147, %cst_93 [2] : vector<2x8x64xf32> to vector<2x8xf32>
    %149 = vector.shape_cast %148 : vector<2x8xf32> to vector<2x8x1xf32>
    %150 = arith.addf %144, %149 : vector<2x8x1xf32>
    %151 = math.log %150 : vector<2x8x1xf32>
    %152 = arith.addf %142, %151 : vector<2x8x1xf32>
    %153 = arith.subf %152, %136 : vector<2x8x1xf32>
    %154 = vector.shape_cast %153 : vector<2x8x1xf32> to vector<1x2x8x1xf32>
    %cst_94 = arith.constant dense<0.000000e+00> : vector<1xf32>
    %155 = vector.multi_reduction <add>, %154, %cst_94 [1, 2, 3] : vector<1x2x8x1xf32> to vector<1xf32>
    %156 = vector.shape_cast %155 : vector<1xf32> to vector<1x1x1x1xf32>
    %157 = vector.extract %156[0, 0, 0, 0] : f32 from vector<1x1x1x1xf32>
    %158 = arith.addf %128, %157 : f32
    %cst_95 = arith.constant 1.250000e-01 : f32
    %159 = arith.mulf %158, %cst_95 : f32
    %c0_96 = arith.constant 0 : index
    %160 = memref.load %arg8[%c0_96] : memref<1xf32, #tpu.memory_space<smem>>
    memref.store %159, %arg8[%c0_96] : memref<1xf32, #tpu.memory_space<smem>>
    return
  }
}

</mosaic_0001>

<bundles_post_ra>
// kernel: intra_inter_contrastive_forward.1
= control target key start
LH: loop header
LB: loop body
LE: loop exit
PB: predicated region body
PF: predicated region fallthrough
CT: control target
= control target key end

     0   :  { %vm97_vm0 = vcmask 261120   ;;  %v2987_v3 = vmov 0.0|0.0   ;;  %vm138_vm1 = vcmask 253952   ;;  %vm2988_vm2 = vmmov 0   ;;  %s4269_s0 = inlined_call_operand.vmem [shape: f32[6,8,32], index: 0, kind: input, shape index: {}]   ;;  %s4270_s1 = inlined_call_operand.vmem [shape: f32[6,32,32], index: 1, kind: input, shape index: {}, may-alias: {1,9}]   ;;  %s4271_s2 = inlined_call_operand.vmem [shape: f32[6,1,32], index: 2, kind: input, shape index: {}, may-alias: {2,10}]   ;;  %s4272_s3 = inlined_call_operand.vmem [shape: f32[6,32,32], index: 3, kind: input, shape index: {}, may-alias: {3,11}]   ;;  %s4273_s4 = inlined_call_operand.vmem [shape: f32[6,1,32], index: 4, kind: input, shape index: {}, may-alias: {4,12}]   ;;  %s4274_s5 = inlined_call_operand.vmem [shape: f32[6,32,16], index: 5, kind: input, shape index: {}, may-alias: {5,13}]   ;;  %s4275_s6 = inlined_call_operand.vmem [shape: f32[6,1,16], index: 6, kind: input, shape index: {}, may-alias: {6,14}]   ;;  %s4276_s7 = inlined_call_operand.vmem [shape: f32[5,16,64], index: 7, kind: input, shape index: {}]   ;;  %s4277_s8 = inlined_call_operand.hbm [shape: f32[1], index: 8, kind: output, shape index: {0}]   ;;  %s4278_s9 = inlined_call_operand.vmem [shape: f32[6,32,32], index: 9, kind: output, shape index: {1}, may-alias: {1,9}]   ;;  %s4279_s10 = inlined_call_operand.vmem [shape: f32[6,1,32], index: 10, kind: output, shape index: {2}, may-alias: {2,10}]   ;;  %s4280_s11 = inlined_call_operand.vmem [shape: f32[6,32,32], index: 11, kind: output, shape index: {3}, may-alias: {3,11}]   ;;  %s4281_s12 = inlined_call_operand.vmem [shape: f32[6,1,32], index: 12, kind: output, shape index: {4}, may-alias: {4,12}]   ;;  %s4282_s13 = inlined_call_operand.vmem [shape: f32[6,32,16], index: 13, kind: output, shape index: {5}, may-alias: {5,13}]   ;;  %s4283_s14 = inlined_call_operand.vmem [shape: f32[6,1,16], index: 14, kind: output, shape index: {6}, may-alias: {6,14}]  }
   0x1   :  { %v37_v0 = vld [vmem:[%s4270_s1] sm:$0xff]  ;;  %v38_v1 = vld [vmem:[%s4270_s1 + $0x8] sm:$0xff]  ;;  %2802 = vmatprep.subr.bf16.mxu0 %v2987_v3  ;;  %2808 = vmatprep.subr.bf16.mxu1 %v2987_v3  ;;  %v2989_v34 = vmov 0.0  }
   0x2   :  { %v49_v2 = vld [vmem:[%s4270_s1 + $0x60] sm:$0xff]  ;;  %v50_v4 = vld [vmem:[%s4270_s1 + $0x68] sm:$0xff]  ;;  %v73_v6 = vmul.f32 0.0009698463, %v37_v0  ;;  %v2803_v7 = vpack.c.bf16 %v38_v1, %v37_v0  ;;  %v74_v10 = vmul.f32 0.0009698463, %v38_v1  ;;  %2577 = vmatprep.mubr.msk.f32.mxu0 %vm2988_vm2, %v2989_v34  ;;  %2588 = vmatprep.mubr.msk.f32.mxu1 %vm2988_vm2, %v2989_v34 }
   0x3   :  { %v61_v5 = vmul.f32 0.9990302, %v49_v2  ;;  %98 = vst.msk [vmem:[%s4278_s9] sm:$0xff] %vm97_vm0, %v37_v0  ;;  %99 = vst.msk [vmem:[%s4278_s9 + $0x8] sm:$0xff] %vm97_vm0, %v38_v1  ;;  %v62_v9 = vmul.f32 0.9990302, %v50_v4 }
   0x4   :  { %2804 = vmatpush3.bf16.msra.mxu0 %v2803_v7  ;;  %v362_v29 = vld [vmem:[%s4269_s0] sm:$0xff]  ;;  %v363_v35 = vld [vmem:[%s4269_s0 + $0x8] sm:$0xff] }
   0x5   :  { %v3101_v13 = vadd.f32 %v73_v6, %v61_v5  ;;  %v3115_v19 = vadd.f32 %v74_v10, %v62_v9  ;;  %2805 = vmatprep.subr.bf16.mxu0 %v2987_v3  ;;  %v3237_v37 = vld [vmem:[%s4272_s3] sm:$0xff]  ;;  %v3242_v38 = vld [vmem:[%s4272_s3 + $0x8] sm:$0xff] }
   0x6   :  { %206 = vst.msk [vmem:[%s4280_s11] sm:$0xff] %vm97_vm0, %v3237_v37  ;;  %207 = vst.msk [vmem:[%s4280_s11 + $0x8] sm:$0xff] %vm97_vm0, %v3242_v38  ;;  %v2821_v39 = vpack.c.bf16 %v3242_v38, %v3237_v37  ;;  %v3270_v42 = vld [vmem:[%s4271_s2] sm:$0x1] }
   0x7   :  { %139 = vst.msk [vmem:[%s4279_s10] sm:$0x1] %vm138_vm1, %v3270_v42 }
   0xa   :  { %v41_v8 = vld [vmem:[%s4270_s1 + $0x20] sm:$0xff]  ;;  %v42_v11 = vld [vmem:[%s4270_s1 + $0x28] sm:$0xff] }
   0xb   :  { %v53_v12 = vld [vmem:[%s4270_s1 + $0x80] sm:$0xff]  ;;  %v77_v16 = vmul.f32 0.0009698463, %v41_v8  ;;  %v2809_v17 = vpack.c.bf16 %v42_v11, %v41_v8  ;;  %v78_v21 = vmul.f32 0.0009698463, %v42_v11 }
   0xc   :  { %102 = vst.msk [vmem:[%s4278_s9 + $0x20] sm:$0xff] %vm97_vm0, %v41_v8  ;;  %v65_v15 = vmul.f32 0.9990302, %v53_v12 }
   0xd   :  { %2810 = vmatpush3.bf16.msra.mxu1 %v2809_v17  ;;  %v3260_v40 = vld [vmem:[%s4272_s3 + $0x20] sm:$0xff]  ;;  %v3265_v41 = vld [vmem:[%s4272_s3 + $0x28] sm:$0xff] }
   0xe   :  { %v3138_v24 = vadd.f32 %v77_v16, %v65_v15  ;;  %2811 = vmatprep.subr.bf16.mxu1 %v2987_v3  ;;  %210 = vst.msk [vmem:[%s4280_s11 + $0x20] sm:$0xff] %vm97_vm0, %v3260_v40  ;;  %211 = vst.msk [vmem:[%s4280_s11 + $0x28] sm:$0xff] %vm97_vm0, %v3265_v41 }
  0x13   :  { %v54_v14 = vld [vmem:[%s4270_s1 + $0x88] sm:$0xff] }
  0x14   :  { %103 = vst.msk [vmem:[%s4278_s9 + $0x28] sm:$0xff] %vm97_vm0, %v42_v11  ;;  %v66_v20 = vmul.f32 0.9990302, %v54_v14 }
  0x16   :  { %v3162_v27 = vadd.f32 %v78_v21, %v66_v20 }
  0x1b   :  { %v3113_v18 = vld [vmem:[%s4270_s1 + $0x10] sm:$0xff]  ;;  %v3121_v22 = vld [vmem:[%s4270_s1 + $0x18] sm:$0xff] }
  0x1c   :  { %100 = vst.msk [vmem:[%s4278_s9 + $0x10] sm:$0xff] %vm97_vm0, %v3113_v18  ;;  %v2806_v25 = vpack.c.bf16 %v3121_v22, %v3113_v18 }
  0x1e   :  { %2807 = vmatpush3.bf16.msra.mxu0 %v2806_v25 }
  0x1f   :  { %2814 = vmatprep.subr.bf16.mxu0 %v2987_v3 }
  0x21   :  { %2578 = vmatmul.mubr.msk.f32.vlgmr.msra.gmra.mrb[0].mxu0 %vm97_vm0, %v362_v29 }
  0x23   :  { %v3131_v23 = vld [vmem:[%s4270_s1 + $0x30] sm:$0xff] }
  0x24   :  { %2396 = vst.msk [vmem:[%s4278_s9 + $0x60] sm:$0xff] %vm97_vm0, %v3101_v13  ;;  %101 = vst.msk [vmem:[%s4278_s9 + $0x18] sm:$0xff] %vm97_vm0, %v3121_v22 }
  0x2b   :  { %v3150_v26 = vld [vmem:[%s4270_s1 + $0x38] sm:$0xff] }
  0x2c   :  { %104 = vst.msk [vmem:[%s4278_s9 + $0x30] sm:$0xff] %vm97_vm0, %v3131_v23  ;;  %2397 = vst.msk [vmem:[%s4278_s9 + $0x68] sm:$0xff] %vm97_vm0, %v3115_v19  ;;  %v2812_v28 = vpack.c.bf16 %v3150_v26, %v3131_v23 }
  0x2d   :  { %105 = vst.msk [vmem:[%s4278_s9 + $0x38] sm:$0xff] %vm97_vm0, %v3150_v26 }
  0x2e   :  { %2813 = vmatpush3.bf16.msra.mxu1 %v2812_v28 }
  0x2f   :  { %2820 = vmatprep.subr.bf16.mxu1 %v2987_v3 }
  0x34   :  { %v3178_v30 = vld [vmem:[%s4270_s1 + $0x40] sm:$0xff] }
  0x35   :  { %2400 = vst.msk [vmem:[%s4278_s9 + $0x80] sm:$0xff] %vm97_vm0, %v3138_v24 }
  0x3c   :  { %v3188_v31 = vld [vmem:[%s4270_s1 + $0x48] sm:$0xff] }
  0x3d   :  { %106 = vst.msk [vmem:[%s4278_s9 + $0x40] sm:$0xff] %vm97_vm0, %v3178_v30  ;;  %v2815_v36 = vpack.c.bf16 %v3188_v31, %v3178_v30 }
  0x44   :  { %v3198_v32 = vld [vmem:[%s4270_s1 + $0x50] sm:$0xff]  ;;  %v3203_v33 = vld [vmem:[%s4270_s1 + $0x58] sm:$0xff] }
  0x45   :  { %2401 = vst.msk [vmem:[%s4278_s9 + $0x88] sm:$0xff] %vm97_vm0, %v3162_v27  ;;  %107 = vst.msk [vmem:[%s4278_s9 + $0x48] sm:$0xff] %vm97_vm0, %v3188_v31 }
  0x46   :  { %108 = vst.msk [vmem:[%s4278_s9 + $0x50] sm:$0xff] %vm97_vm0, %v3198_v32  ;;  %109 = vst.msk [vmem:[%s4278_s9 + $0x58] sm:$0xff] %vm97_vm0, %v3203_v33 }
  0x47   :  { %20 = vsyncpa [#allocation3], 0  ;;  %2816 = vmatpush3.bf16.msra.mxu0 %v2815_v36  ;;  %v2818_v43 = vpack.c.bf16 %v3203_v33, %v3198_v32  ;;  %2599 = vmatprep.mubr.msk.f32.mxu0 %vm2988_vm2, %v2989_v34  ;;  %v364_v44 = vld [vmem:[%s4269_s0 + $0x10] sm:$0xff]  ;;  %v2827_v45 = vpack.c.bf16 %v3265_v41, %v3260_v40  ;;  %v3316_v47 = vld [vmem:[%s4272_s3 + $0x18] sm:$0xff]  ;;  %vm313_vm3 = vcmask 130048   ;;  %v371_v63 = vlaneseq  ;;  %s2975_s21 = scalar_lea.hbm %s4277_s8, 16 }
  0x48   :  { %2589 = vmatmul.mubr.msk.f32.vlgmr.msra.gmra.mrb[0].mxu1 %vm97_vm0, %v363_v35  ;;  %2817 = vmatprep.subr.bf16.mxu0 %v2987_v3  ;;  %v3311_v46 = vld [vmem:[%s4272_s3 + $0x10] sm:$0xff]  ;;  %v3326_v49 = vld [vmem:[%s4271_s2 + $0x1] sm:$0x1]  ;;  %v3422_v59 = vld [vmem:[%s4274_s5 + $0x8] sm:$0xff]  ;;  %vm354_vm4 = vcmask 122880   ;;  %vm2085_vm5 = vcmask 523264   ;;  %p2976_p0 = scmp.ne.s32.totalorder %s4277_s8, %s2975_s21  ;;  %p2979_p1 = scmp.lt.u32.totalorder %s2975_s21, %s4277_s8 }
  0x49   :  { %2822 = vmatpush3.bf16.msra.mxu1 %v2821_v39  ;;  %2610 = vmatprep.mubr.msk.f32.mxu1 %vm2988_vm2, %v2989_v34  ;;  %v3321_v48 = vld [vmem:[%s4272_s3 + $0x30] sm:$0xff]  ;;  %v2824_v50 = vpack.c.bf16 %v3316_v47, %v3311_v46  ;;  %140 = vst.msk [vmem:[%s4279_s10 + $0x1] sm:$0x1] %vm138_vm1, %v3326_v49  ;;  %v3417_v58 = vld [vmem:[%s4274_s5] sm:$0xff]  ;;  %v372_v0 = vshrl.u32 %v371_v63, 7  ;;  %vm2140_vm6 = vcmask 7168  }
  0x4a   :  { %2823 = vmatprep.subr.bf16.mxu1 %v2987_v3  ;;  %208 = vst.msk [vmem:[%s4280_s11 + $0x10] sm:$0xff] %vm97_vm0, %v3311_v46  ;;  %209 = vst.msk [vmem:[%s4280_s11 + $0x18] sm:$0xff] %vm97_vm0, %v3316_v47  ;;  %v3427_v60 = vld [vmem:[%s4274_s5 + $0x20] sm:$0xff]  ;;  %v2839_v10 = vpack.c.bf16 %v3422_v59, %v3417_v58  ;;  %p2981_p2 = pnand %p2979_p1, %p2976_p0 }
  0x4b   :  { %2819 = vmatpush3.bf16.msra.mxu0 %v2818_v43  ;;  %314 = vst.msk [vmem:[%s4282_s13] sm:$0xff] %vm313_vm3, %v3417_v58  ;;  %315 = vst.msk [vmem:[%s4282_s13 + $0x8] sm:$0xff] %vm313_vm3, %v3422_v59  ;;  %v3452_v62 = vld [vmem:[%s4273_s4] sm:$0x1]  ;;  %v3464_v1 = vsub.s32 0, %v372_v0 }
  0x4c   :  { %2826 = vmatprep.subr.bf16.mxu0 %v2987_v3  ;;  %246 = vst.msk [vmem:[%s4281_s12] sm:$0x1] %vm138_vm1, %v3452_v62 }
  0x4d   :  { %2825 = vmatpush3.bf16.msra.mxu1 %v2824_v50  ;;  %v374_v2 = vrot.slane %v3270_v42, %v3464_v1  ;;  %v378_v4 = vrot.slane %v3326_v49, %v3464_v1 }
  0x4e   :  { %2600 = vmatmul.mubr.msk.f32.vlgmr.msra.gmra.mrb[2].mxu0 %vm97_vm0, %v364_v44  ;;  %2832 = vmatprep.subr.bf16.mxu1 %v2987_v3  ;;  %v75_v44 = vmul.f32 0.0009698463, %v3113_v18  ;;  %v51_v18 = vld [vmem:[%s4270_s1 + $0x70] sm:$0xff] }
  0x4f   :  { %2828 = vmatpush3.bf16.msra.mxu0 %v2827_v45  ;;  %2621 = vmatprep.mubr.msk.f32.mxu0 %vm2988_vm2, %v2989_v34  ;;  %v76_v45 = vmul.f32 0.0009698463, %v3121_v22  ;;  %v52_v22 = vld [vmem:[%s4270_s1 + $0x78] sm:$0xff]  ;;  %v63_v63 = vmul.f32 0.9990302, %v51_v18 }
  0x50   :  { %2829 = vmatprep.subr.bf16.mxu0 %v2987_v3  ;;  %v3387_v55 = vld [vmem:[%s4271_s2 + $0x2] sm:$0x1]  ;;  %v64_v0 = vmul.f32 0.9990302, %v52_v22  ;;  %v83_v22 = vmul.f32 0.0009698463, %v3198_v32 }
  0x51   :  { %v3343_v51 = vld [vmem:[%s4272_s3 + $0x38] sm:$0xff]  ;;  %141 = vst.msk [vmem:[%s4279_s10 + $0x2] sm:$0x1] %vm138_vm1, %v3387_v55  ;;  %v382_v15 = vrot.slane %v3387_v55, %v3464_v1 }
  0x52   :  { %212 = vst.msk [vmem:[%s4280_s11 + $0x30] sm:$0xff] %vm97_vm0, %v3321_v48  ;;  %213 = vst.msk [vmem:[%s4280_s11 + $0x38] sm:$0xff] %vm97_vm0, %v3343_v51  ;;  %v2830_v52 = vpack.c.bf16 %v3343_v51, %v3321_v48  ;;  %v3442_v61 = vld [vmem:[%s4274_s5 + $0x28] sm:$0xff] }
  0x53   :  { %318 = vst.msk [vmem:[%s4282_s13 + $0x20] sm:$0xff] %vm313_vm3, %v3427_v60  ;;  %319 = vst.msk [vmem:[%s4282_s13 + $0x28] sm:$0xff] %vm313_vm3, %v3442_v61  ;;  %v2845_v17 = vpack.c.bf16 %v3442_v61, %v3427_v60  ;;  %v3496_v25 = vld [vmem:[%s4273_s4 + $0x1] sm:$0x1] }
  0x54   :  { %2831 = vmatpush3.bf16.msra.mxu0 %v2830_v52  ;;  %247 = vst.msk [vmem:[%s4281_s12 + $0x1] sm:$0x1] %vm138_vm1, %v3496_v25 }
  0x55   :  { %2838 = vmatprep.subr.bf16.mxu0 %v2987_v3 }
  0x59   :  { %v3366_v53 = vld [vmem:[%s4272_s3 + $0x40] sm:$0xff]  ;;  %v3371_v54 = vld [vmem:[%s4272_s3 + $0x48] sm:$0xff] }
  0x5a   :  { %214 = vst.msk [vmem:[%s4280_s11 + $0x40] sm:$0xff] %vm97_vm0, %v3366_v53  ;;  %215 = vst.msk [vmem:[%s4280_s11 + $0x48] sm:$0xff] %vm97_vm0, %v3371_v54  ;;  %v2833_v6 = vpack.c.bf16 %v3371_v54, %v3366_v53  ;;  %v3501_v28 = vld [vmem:[%s4274_s5 + $0x10] sm:$0xff]  ;;  %v3506_v29 = vld [vmem:[%s4274_s5 + $0x18] sm:$0xff] }
  0x5b   :  { %316 = vst.msk [vmem:[%s4282_s13 + $0x10] sm:$0xff] %vm313_vm3, %v3501_v28  ;;  %317 = vst.msk [vmem:[%s4282_s13 + $0x18] sm:$0xff] %vm313_vm3, %v3506_v29  ;;  %v2842_v35 = vpack.c.bf16 %v3506_v29, %v3501_v28 }
  0x61   :  { %v3397_v56 = vld [vmem:[%s4272_s3 + $0x50] sm:$0xff]  ;;  %v3402_v57 = vld [vmem:[%s4272_s3 + $0x58] sm:$0xff] }
  0x62   :  { %216 = vst.msk [vmem:[%s4280_s11 + $0x50] sm:$0xff] %vm97_vm0, %v3397_v56  ;;  %217 = vst.msk [vmem:[%s4280_s11 + $0x58] sm:$0xff] %vm97_vm0, %v3402_v57  ;;  %v2836_v14 = vpack.c.bf16 %v3402_v57, %v3397_v56  ;;  %v3528_v36 = vld [vmem:[%s4274_s5 + $0x30] sm:$0xff]  ;;  %v3533_v39 = vld [vmem:[%s4274_s5 + $0x38] sm:$0xff] }
  0x63   :  { %320 = vst.msk [vmem:[%s4282_s13 + $0x30] sm:$0xff] %vm313_vm3, %v3528_v36  ;;  %321 = vst.msk [vmem:[%s4282_s13 + $0x38] sm:$0xff] %vm313_vm3, %v3533_v39  ;;  %v2848_v43 = vpack.c.bf16 %v3533_v39, %v3528_v36 }
  0x6a   :  { %v3553_v50 = vld [vmem:[%s4274_s5 + $0x40] sm:$0xff]  ;;  %v3558_v52 = vld [vmem:[%s4274_s5 + $0x48] sm:$0xff] }
  0x6b   :  { %322 = vst.msk [vmem:[%s4282_s13 + $0x40] sm:$0xff] %vm313_vm3, %v3553_v50  ;;  %323 = vst.msk [vmem:[%s4282_s13 + $0x48] sm:$0xff] %vm313_vm3, %v3558_v52 }
  0xf4   :  { %v455_v5 = vpop.f32.mrb[0].mxu0 }
  0xf5   :  { %v456_v7 = vadd.f32 %v455_v5, %v374_v2  ;;  %v2579_v8 = vpop.f32.mrb[1].mxu0  ;;  %v3580_v2 = vld [vmem:[%s4273_s4 + $0x2] sm:$0x1]  ;;  %v3584_v5 = vadd.f32 %v76_v45, %v64_v0 }
  0xf6   :  { %248 = vst.msk [vmem:[%s4281_s12 + $0x2] sm:$0x1] %vm138_vm1, %v3580_v2  ;;  %v57_v8 = vld [vmem:[%s4270_s1 + $0xa0] sm:$0xff] }
  0xf7   :  { %2611 = vmatmul.mubr.msk.f32.vlgmr.msra.gmra.mrb[2].mxu1 %vm97_vm0, %v456_v7  ;;  %v3599_v7 = vld [vmem:[%s4274_s5 + $0x58] sm:$0xff]  ;;  %2399 = vst.msk [vmem:[%s4278_s9 + $0x78] sm:$0xff] %vm97_vm0, %v3584_v5 }
  0xf8   :  { %2834 = vmatpush3.bf16.msra.mxu1 %v2833_v6  ;;  %2632 = vmatprep.mubr.msk.f32.mxu1 %vm2988_vm2, %v2989_v34  ;;  %v3594_v6 = vld [vmem:[%s4274_s5 + $0x50] sm:$0xff] }
  0xf9   :  { %2835 = vmatprep.subr.bf16.mxu1 %v2987_v3  ;;  %324 = vst.msk [vmem:[%s4282_s13 + $0x50] sm:$0xff] %vm313_vm3, %v3594_v6  ;;  %325 = vst.msk [vmem:[%s4282_s13 + $0x58] sm:$0xff] %vm313_vm3, %v3599_v7 }
  0xfc   :  { %2837 = vmatpush3.bf16.msra.mxu1 %v2836_v14 }
  0xfd   :  { %2844 = vmatprep.subr.bf16.mxu1 %v2987_v3 }
 0x11b   :  { %v528_v9 = vpop.f32.mrb[0].mxu1 }
 0x11c   :  { %v529_v11 = vadd.f32 %v528_v9, %v378_v4  ;;  %v2590_v12 = vpop.f32.mrb[1].mxu1  ;;  %v3582_v4 = vadd.f32 %v75_v44, %v63_v63 }
 0x11d   :  { %v81_v12 = vmul.f32 0.0009698463, %v3178_v30 }
 0x11e   :  { %2622 = vmatmul.mubr.msk.f32.vlgmr.msra.gmra.mrb[4].mxu0 %vm97_vm0, %v529_v11  ;;  %2398 = vst.msk [vmem:[%s4278_s9 + $0x70] sm:$0xff] %vm97_vm0, %v3582_v4  ;;  %v2860_v9 = vpack.c.bf16 %v3584_v5, %v3582_v4  ;;  %v69_v11 = vmul.f32 0.9990302, %v57_v8  ;;  %v84_v8 = vmul.f32 0.0009698463, %v3203_v33  ;;  %v158_v4 = vld [vmem:[%s4272_s3 + $0x60] sm:$0xff] }
 0x11f   :  { %2840 = vmatpush3.bf16.msra.mxu0 %v2839_v10  ;;  %2643 = vmatprep.mubr.msk.f32.mxu0 %vm2988_vm2, %v2989_v34  ;;  %v3682_v33 = vld [vmem:[%s4275_s6] sm:$0x1]  ;;  %v159_v5 = vld [vmem:[%s4272_s3 + $0x68] sm:$0xff] }
 0x120   :  { %2841 = vmatprep.subr.bf16.mxu0 %v2987_v3  ;;  %355 = vst.msk [vmem:[%s4283_s14] sm:$0x1] %vm354_vm4, %v3682_v33 }
 0x121   :  { %v601_v16 = vpop.f32.mrb[2].mxu0 }
 0x122   :  { %v602_v20 = vadd.f32 %v601_v16, %v382_v15  ;;  %v2601_v21 = vpop.f32.mrb[3].mxu0  ;;  %v82_v15 = vmul.f32 0.0009698463, %v3188_v31  ;;  %v79_v16 = vmul.f32 0.0009698463, %v3131_v23 }
 0x123   :  { %2843 = vmatpush3.bf16.msra.mxu0 %v2842_v35 }
 0x124   :  { %2633 = vmatmul.mubr.msk.f32.vlgmr.msra.gmra.mrb[4].mxu1 %vm97_vm0, %v602_v20  ;;  %2850 = vmatprep.subr.bf16.mxu0 %v2987_v3  ;;  %v3633_v20 = vadd.f32 %v81_v12, %v69_v11 }
 0x125   :  { %2846 = vmatpush3.bf16.msra.mxu1 %v2845_v17  ;;  %2654 = vmatprep.mubr.msk.f32.mxu1 %vm2988_vm2, %v2989_v34  ;;  %v58_v10 = vld [vmem:[%s4270_s1 + $0xa8] sm:$0xff]  ;;  %v80_v17 = vmul.f32 0.0009698463, %v3150_v26  ;;  %v55_v35 = vld [vmem:[%s4270_s1 + $0x90] sm:$0xff] }
 0x126   :  { %2847 = vmatprep.subr.bf16.mxu1 %v2987_v3  ;;  %v70_v14 = vmul.f32 0.9990302, %v58_v10  ;;  %v59_v30 = vld [vmem:[%s4270_s1 + $0xb0] sm:$0xff]  ;;  %v67_v23 = vmul.f32 0.9990302, %v55_v35  ;;  %v2851_v35 = vpack.c.bf16 %v3558_v52, %v3553_v50 }
 0x127   :  { %v71_v45 = vmul.f32 0.9990302, %v59_v30 }
 0x128   :  { %v3635_v21 = vadd.f32 %v82_v15, %v70_v14  ;;  %v91_v63 = vadd.f32 %v79_v16, %v67_v23  ;;  %v611_v14 = vrot.slane %v3452_v62, %v3464_v1  ;;  %v615_v15 = vrot.slane %v3496_v25, %v3464_v1 }
 0x129   :  { %2849 = vmatpush3.bf16.msra.mxu1 %v2848_v43  ;;  %v56_v43 = vld [vmem:[%s4270_s1 + $0x98] sm:$0xff]  ;;  %v95_v10 = vadd.f32 %v83_v22, %v71_v45  ;;  %v619_v45 = vrot.slane %v3580_v2, %v3464_v1 }
 0x12a   :  { %2856 = vmatprep.subr.bf16.mxu1 %v2987_v3  ;;  %2404 = vst.msk [vmem:[%s4278_s9 + $0xa0] sm:$0xff] %vm97_vm0, %v3633_v20  ;;  %v68_v26 = vmul.f32 0.9990302, %v56_v43  ;;  %v2869_v44 = vpack.c.bf16 %v3635_v21, %v3633_v20 }
 0x12c   :  { %v92_v0 = vadd.f32 %v80_v17, %v68_v26  ;;  %v2857_v26 = vpack.c.bf16 %v3115_v19, %v3101_v13 }
 0x12e   :  { %v2866_v11 = vpack.c.bf16 %v92_v0, %v91_v63 }
 0x131   :  { %v60_v31 = vld [vmem:[%s4270_s1 + $0xb8] sm:$0xff] }
 0x132   :  { %2405 = vst.msk [vmem:[%s4278_s9 + $0xa8] sm:$0xff] %vm97_vm0, %v3635_v21  ;;  %v72_v18 = vmul.f32 0.9990302, %v60_v31  ;;  %2402 = vst.msk [vmem:[%s4278_s9 + $0x90] sm:$0xff] %vm97_vm0, %v91_v63  ;;  %v2863_v63 = vpack.c.bf16 %v3162_v27, %v3138_v24  ;;  %v366_v24 = vld [vmem:[%s4269_s0 + $0x20] sm:$0xff]  ;;  %v367_v27 = vld [vmem:[%s4269_s0 + $0x28] sm:$0xff] }
 0x133   :  { %2403 = vst.msk [vmem:[%s4278_s9 + $0x98] sm:$0xff] %vm97_vm0, %v92_v0  ;;  %2406 = vst.msk [vmem:[%s4278_s9 + $0xb0] sm:$0xff] %vm97_vm0, %v95_v10 }
 0x134   :  { %v96_v12 = vadd.f32 %v84_v8, %v72_v18  ;;  %v2854_v18 = vpack.c.bf16 %v3599_v7, %v3594_v6  ;;  %v365_v8 = vld [vmem:[%s4269_s0 + $0x18] sm:$0xff] }
 0x136   :  { %2407 = vst.msk [vmem:[%s4278_s9 + $0xb8] sm:$0xff] %vm97_vm0, %v96_v12  ;;  %v2872_v32 = vpack.c.bf16 %v96_v12, %v95_v10  ;;  %v182_v10 = vmul.f32 0.0009698463, %v3237_v37  ;;  %v183_v12 = vmul.f32 0.0009698463, %v3242_v38  ;;  %v161_v37 = vld [vmem:[%s4272_s3 + $0x78] sm:$0xff] }
 0x137   :  { %v126_v38 = vld [vmem:[%s4271_s2 + $0x3] sm:$0x1] }
 0x1ca   :  { %v692_v16 = vpop.f32.mrb[2].mxu1 }
 0x1cb   :  { %v693_v17 = vadd.f32 %v692_v16, %v611_v14  ;;  %v2612_v20 = vpop.f32.mrb[3].mxu1 }
 0x1cd   :  { %v842_v43 = vmax.f32 %v693_v17, 0.0  ;;  %v173_v17 = vmul.f32 0.9990302, %v161_v37  ;;  %v133_v37 = vmul.f32 0.0009698463, %v3326_v49 }
 0x1cf   :  { %2644 = vmatmul.mubr.msk.f32.vlgmr.msra.gmra.mrb[6].mxu0 %vm97_vm0, %v842_v43  ;;  %v184_v43 = vmul.f32 0.0009698463, %v3311_v46 }
 0x1d0   :  { %2852 = vmatpush3.bf16.msra.mxu0 %v2851_v35  ;;  %2665 = vmatprep.mubr.msk.f32.mxu0 %vm2988_vm2, %v2989_v34  ;;  %v132_v35 = vmul.f32 0.0009698463, %v3270_v42 }
 0x1d1   :  { %2853 = vmatprep.subr.bf16.mxu0 %v2987_v3 }
 0x1d4   :  { %2855 = vmatpush3.bf16.msra.mxu0 %v2854_v18 }
 0x1d5   :  { %2862 = vmatprep.subr.bf16.mxu0 %v2987_v3 }
 0x1f1   :  { %v765_v21 = vpop.f32.mrb[4].mxu0 }
 0x1f2   :  { %v766_v30 = vadd.f32 %v765_v21, %v615_v15  ;;  %v2623_v23 = vpop.f32.mrb[5].mxu0  ;;  %v160_v15 = vld [vmem:[%s4272_s3 + $0x70] sm:$0xff]  ;;  %v129_v21 = vmul.f32 0.9990302, %v126_v38 }
 0x1f3   :  { %v172_v16 = vmul.f32 0.9990302, %v160_v15 }
 0x1f4   :  { %v843_v31 = vmax.f32 %v766_v30, 0.0  ;;  %v185_v30 = vmul.f32 0.0009698463, %v3316_v47  ;;  %v3779_v23 = vadd.f32 %v132_v35, %v129_v21 }
 0x1f6   :  { %2655 = vmatmul.mubr.msk.f32.vlgmr.msra.gmra.mrb[6].mxu1 %vm97_vm0, %v843_v31  ;;  %v197_v46 = vadd.f32 %v185_v30, %v173_v17  ;;  %2408 = vst.msk [vmem:[%s4279_s10 + $0x3] sm:$0x1] %vm138_vm1, %v3779_v23 }
 0x1f7   :  { %2858 = vmatpush3.bf16.msra.mxu1 %v2857_v26  ;;  %v838_v22 = vpop.f32.mrb[4].mxu1  ;;  %2676 = vmatprep.mubr.msk.f32.mxu1 %vm2988_vm2, %v2989_v34  ;;  %v196_v26 = vadd.f32 %v184_v43, %v172_v16  ;;  %v134_v16 = vmul.f32 0.0009698463, %v3387_v55  ;;  %v188_v55 = vmul.f32 0.0009698463, %v3321_v48 }
 0x1f8   :  { %v839_v13 = vadd.f32 %v838_v22, %v619_v45  ;;  %2859 = vmatprep.subr.bf16.mxu1 %v2987_v3  ;;  %v2634_v19 = vpop.f32.mrb[5].mxu1  ;;  %v186_v22 = vmul.f32 0.0009698463, %v3260_v40  ;;  %v189_v43 = vmul.f32 0.0009698463, %v3343_v51 }
 0x1f9   :  { %v187_v19 = vmul.f32 0.0009698463, %v3265_v41 }
 0x1fa   :  { %v844_v0 = vmax.f32 %v839_v13, 0.0 }
 0x1fb   :  { %2861 = vmatpush3.bf16.msra.mxu1 %v2860_v9  ;;  %v170_v9 = vmul.f32 0.9990302, %v158_v4  ;;  %v191_v4 = vmul.f32 0.0009698463, %v3371_v54 }
 0x1fc   :  { %2868 = vmatprep.subr.bf16.mxu1 %v2987_v3  ;;  %2666 = vmatmul.mubr.msk.f32.vlgmr.msra.gmra.mrb[8].mxu0 %vm97_vm0, %v844_v0 }
 0x1fd   :  { %2864 = vmatpush3.bf16.msra.mxu0 %v2863_v63  ;;  %2687 = vmatprep.mubr.msk.f32.mxu0 %vm2988_vm2, %v2989_v34  ;;  %v2878_v63 = vpack.c.bf16 %v197_v46, %v196_v26 }
 0x1fe   :  { %2677 = vmatmul.mubr.msk.f32.vlgmr.msra.gmra.mrb[8].mxu1 %vm97_vm0, %v365_v8  ;;  %2865 = vmatprep.subr.bf16.mxu0 %v2987_v3 }
 0x1ff   :  { %2870 = vmatpush3.bf16.msra.mxu1 %v2869_v44  ;;  %2698 = vmatprep.mubr.msk.f32.mxu1 %vm2988_vm2, %v2989_v34  ;;  %v171_v44 = vmul.f32 0.9990302, %v159_v5  ;;  %v127_v5 = vld [vmem:[%s4271_s2 + $0x4] sm:$0x1] }
 0x200   :  { %2871 = vmatprep.subr.bf16.mxu1 %v2987_v3 }
 0x201   :  { %2867 = vmatpush3.bf16.msra.mxu0 %v2866_v11  ;;  %v3751_v11 = vld [vmem:[%s4275_s6 + $0x1] sm:$0x1]  ;;  %v195_v14 = vadd.f32 %v183_v12, %v171_v44  ;;  %v130_v12 = vmul.f32 0.9990302, %v127_v5  ;;  %v1109_v5 = vrot.slane %v3779_v23, %v3464_v1 }
 0x202   :  { %2874 = vmatprep.subr.bf16.mxu0 %v2987_v3  ;;  %356 = vst.msk [vmem:[%s4283_s14 + $0x1] sm:$0x1] %vm354_vm4, %v3751_v11 }
 0x203   :  { %2873 = vmatpush3.bf16.msra.mxu1 %v2872_v32  ;;  %v194_v32 = vadd.f32 %v182_v10, %v170_v9  ;;  %2412 = vst.msk [vmem:[%s4280_s11 + $0x68] sm:$0xff] %vm97_vm0, %v195_v14  ;;  %v128_v9 = vld [vmem:[%s4271_s2 + $0x5] sm:$0x1]  ;;  %v136_v21 = vadd.f32 %v133_v37, %v130_v12 }
 0x204   :  { %2688 = vmatmul.mubr.msk.f32.vlgmr.msra.gmra.mrb[10].mxu0 %vm97_vm0, %v366_v24  ;;  %2880 = vmatprep.subr.bf16.mxu1 %v2987_v3  ;;  %v131_v38 = vmul.f32 0.9990302, %v128_v9 }
 0x205   :  { %2709 = vmatprep.mubr.msk.f32.mxu0 %vm2988_vm2, %v2989_v34  ;;  %2411 = vst.msk [vmem:[%s4280_s11 + $0x60] sm:$0xff] %vm97_vm0, %v194_v32  ;;  %v2875_v20 = vpack.c.bf16 %v195_v14, %v194_v32  ;;  %v1113_v37 = vrot.slane %v136_v21, %v3464_v1 }
 0x206   :  { %2699 = vmatmul.mubr.msk.f32.vlgmr.msra.gmra.mrb[10].mxu1 %vm97_vm0, %v367_v27  ;;  %v190_v27 = vmul.f32 0.0009698463, %v3366_v53  ;;  %v137_v35 = vadd.f32 %v134_v16, %v131_v38  ;;  %2409 = vst.msk [vmem:[%s4279_s10 + $0x4] sm:$0x1] %vm138_vm1, %v136_v21  ;;  %v266_v21 = vld [vmem:[%s4274_s5 + $0x68] sm:$0xff] }
 0x207   :  { %2720 = vmatprep.mubr.msk.f32.mxu1 %vm2988_vm2, %v2989_v34  ;;  %2876 = vmatpush3.bf16.msra.mxu0 %v2875_v20 }
 0x208   :  { %2877 = vmatprep.subr.bf16.mxu0 %v2987_v3  ;;  %2410 = vst.msk [vmem:[%s4279_s10 + $0x5] sm:$0x1] %vm138_vm1, %v137_v35  ;;  %v1117_v23 = vrot.slane %v137_v35, %v3464_v1  ;;  %v289_v35 = vmul.f32 0.0009698463, %v3417_v58 }
 0x209   :  { %v3804_v13 = vld [vmem:[%s4275_s6 + $0x2] sm:$0x1] }
 0x20a   :  { %357 = vst.msk [vmem:[%s4283_s14 + $0x2] sm:$0x1] %vm354_vm4, %v3804_v13 }
 0x20b   :  { %2879 = vmatpush3.bf16.msra.mxu0 %v2878_v63 }
 0x20c   :  { %v162_v31 = vld [vmem:[%s4272_s3 + $0x80] sm:$0xff]  ;;  %v163_v45 = vld [vmem:[%s4272_s3 + $0x88] sm:$0xff]  ;;  %2886 = vmatprep.subr.bf16.mxu0 %v2987_v3 }
 0x20d   :  { %v166_v42 = vld [vmem:[%s4272_s3 + $0xa0] sm:$0xff]  ;;  %v174_v47 = vmul.f32 0.9990302, %v162_v31  ;;  %v175_v18 = vmul.f32 0.9990302, %v163_v45 }
 0x20e   :  { %2413 = vst.msk [vmem:[%s4280_s11 + $0x70] sm:$0xff] %vm97_vm0, %v196_v26  ;;  %v178_v8 = vmul.f32 0.9990302, %v166_v42  ;;  %v192_v45 = vmul.f32 0.0009698463, %v3397_v56 }
 0x20f   :  { %v198_v0 = vadd.f32 %v186_v22, %v174_v47  ;;  %v199_v24 = vadd.f32 %v187_v19, %v175_v18  ;;  %v193_v42 = vmul.f32 0.0009698463, %v3402_v57  ;;  %v851_v47 = vrot.slane %v3682_v33, %v3464_v1 }
 0x210   :  { %v3839_v44 = vadd.f32 %v190_v27, %v178_v8  ;;  %v855_v18 = vrot.slane %v3751_v11, %v3464_v1  ;;  %v859_v27 = vrot.slane %v3804_v13, %v3464_v1 }
 0x211   :  { %v2881_v54 = vpack.c.bf16 %v199_v24, %v198_v0 }
 0x213   :  { %2882 = vmatpush3.bf16.msra.mxu1 %v2881_v54 }
 0x214   :  { %2883 = vmatprep.subr.bf16.mxu1 %v2987_v3 }
 0x215   :  { %v167_v40 = vld [vmem:[%s4272_s3 + $0xa8] sm:$0xff] }
 0x216   :  { %2414 = vst.msk [vmem:[%s4280_s11 + $0x78] sm:$0xff] %vm97_vm0, %v197_v46  ;;  %v179_v41 = vmul.f32 0.9990302, %v167_v40  ;;  %2415 = vst.msk [vmem:[%s4280_s11 + $0x80] sm:$0xff] %vm97_vm0, %v198_v0 }
 0x218   :  { %v3841_v10 = vadd.f32 %v191_v4, %v179_v41 }
 0x21a   :  { %v2887_v17 = vpack.c.bf16 %v3841_v10, %v3839_v44 }
 0x21d   :  { %v164_v53 = vld [vmem:[%s4272_s3 + $0x90] sm:$0xff] }
 0x21e   :  { %2416 = vst.msk [vmem:[%s4280_s11 + $0x88] sm:$0xff] %vm97_vm0, %v199_v24  ;;  %v176_v49 = vmul.f32 0.9990302, %v164_v53 }
 0x220   :  { %v200_v26 = vadd.f32 %v188_v55, %v176_v49 }
 0x225   :  { %v165_v32 = vld [vmem:[%s4272_s3 + $0x98] sm:$0xff]  ;;  %v168_v14 = vld [vmem:[%s4272_s3 + $0xb0] sm:$0xff] }
 0x226   :  { %v169_v15 = vld [vmem:[%s4272_s3 + $0xb8] sm:$0xff]  ;;  %v177_v20 = vmul.f32 0.9990302, %v165_v32  ;;  %v180_v30 = vmul.f32 0.9990302, %v168_v14 }
 0x227   :  { %2419 = vst.msk [vmem:[%s4280_s11 + $0xa0] sm:$0xff] %vm97_vm0, %v3839_v44  ;;  %2420 = vst.msk [vmem:[%s4280_s11 + $0xa8] sm:$0xff] %vm97_vm0, %v3841_v10  ;;  %v181_v31 = vmul.f32 0.9990302, %v169_v15 }
 0x228   :  { %v201_v48 = vadd.f32 %v189_v43, %v177_v20  ;;  %2417 = vst.msk [vmem:[%s4280_s11 + $0x90] sm:$0xff] %vm97_vm0, %v200_v26  ;;  %v204_v51 = vadd.f32 %v192_v45, %v180_v30  ;;  %v290_v30 = vmul.f32 0.0009698463, %v3422_v59  ;;  %v234_v45 = vld [vmem:[%s4273_s4 + $0x3] sm:$0x1] }
 0x229   :  { %v205_v56 = vadd.f32 %v193_v42, %v181_v31  ;;  %v278_v31 = vmul.f32 0.9990302, %v266_v21  ;;  %v237_v42 = vmul.f32 0.9990302, %v234_v45  ;;  %v296_v21 = vmul.f32 0.0009698463, %v3533_v39 }
 0x22a   :  { %2418 = vst.msk [vmem:[%s4280_s11 + $0x98] sm:$0xff] %vm97_vm0, %v201_v48  ;;  %v2884_v57 = vpack.c.bf16 %v201_v48, %v200_v26  ;;  %2421 = vst.msk [vmem:[%s4280_s11 + $0xb0] sm:$0xff] %vm97_vm0, %v204_v51  ;;  %v240_v48 = vmul.f32 0.0009698463, %v3452_v62 }
 0x22b   :  { %2422 = vst.msk [vmem:[%s4280_s11 + $0xb8] sm:$0xff] %vm97_vm0, %v205_v56  ;;  %v2890_v46 = vpack.c.bf16 %v205_v56, %v204_v51  ;;  %v302_v56 = vadd.f32 %v290_v30, %v278_v31 }
 0x22c   :  { %2885 = vmatpush3.bf16.msra.mxu1 %v2884_v57  ;;  %v3944_v57 = vadd.f32 %v240_v48, %v237_v42  ;;  %v299_v42 = vmul.f32 0.0009698463, %v3594_v6  ;;  %v300_v48 = vmul.f32 0.0009698463, %v3599_v7 }
 0x22d   :  { %2892 = vmatprep.subr.bf16.mxu1 %v2987_v3 }
 0x22e   :  { %2423 = vst.msk [vmem:[%s4281_s12 + $0x3] sm:$0x1] %vm138_vm1, %v3944_v57 }
 0x2a2   :  { %v932_v22 = vpop.f32.mrb[6].mxu0 }
 0x2a3   :  { %v3900_v19 = vadd.f32 %v932_v22, %v851_v47  ;;  %v2645_v40 = vpop.f32.mrb[7].mxu0  ;;  %v292_v22 = vmul.f32 0.0009698463, %v3506_v29 }
 0x2a5   :  { %v1082_v24 = vmul.f32 %v3900_v19, %v3900_v19 }
 0x2a7   :  { %v1085_v41 = vsel %vm313_vm3, %v1082_v24, 0.0 }
 0x2a8   :  { %1086 = vadd.xlane.f32.xlu0 %v1085_v41 }
 0x2c9   :  { %v1005_v63 = vpop.f32.mrb[6].mxu1 }
 0x2ca   :  { %v3902_v0 = vadd.f32 %v1005_v63, %v855_v18  ;;  %v2656_v8 = vpop.f32.mrb[7].mxu1  ;;  %v291_v18 = vmul.f32 0.0009698463, %v3501_v28 }
 0x2cc   :  { %v1083_v4 = vmul.f32 %v3902_v0, %v3902_v0 }
 0x2ce   :  { %v1088_v44 = vsel %vm313_vm3, %v1083_v4, 0.0 }
 0x2cf   :  { %v1078_v9 = vpop.f32.mrb[8].mxu0  ;;  %1089 = vadd.xlane.f32.xlu0 %v1088_v44 }
 0x2d0   :  { %v3913_v53 = vadd.f32 %v1078_v9, %v859_v27  ;;  %v2667_v54 = vpop.f32.mrb[9].mxu0  ;;  %v293_v27 = vmul.f32 0.0009698463, %v3427_v60 }
 0x2d1   :  { %v1190_v10 = vpop.f32.mrb[8].mxu1 }
 0x2d2   :  { %v1191_v12 = vadd.f32 %v1190_v10, %v1109_v5  ;;  %v2678_v32 = vpop.f32.mrb[9].mxu1  ;;  %v1084_v14 = vmul.f32 %v3913_v53, %v3913_v53  ;;  %v294_v5 = vmul.f32 0.0009698463, %v3442_v61  ;;  %v236_v61 = vld [vmem:[%s4273_s4 + $0x5] sm:$0x1] }
 0x2d3   :  { %v298_v32 = vmul.f32 0.0009698463, %v3558_v52 }
 0x2d4   :  { %2710 = vmatmul.mubr.msk.f32.vlgmr.msra.gmra.mrb[12].mxu0 %vm97_vm0, %v1191_v12  ;;  %v1091_v15 = vsel %vm313_vm3, %v1084_v14, 0.0  ;;  %v297_v12 = vmul.f32 0.0009698463, %v3553_v50  ;;  %v235_v14 = vld [vmem:[%s4273_s4 + $0x4] sm:$0x1] }
 0x2d5   :  { %2888 = vmatpush3.bf16.msra.mxu0 %v2887_v17  ;;  %1092 = vadd.xlane.f32.xlu1 %v1091_v15  ;;  %v265_v17 = vld [vmem:[%s4274_s5 + $0x60] sm:$0xff]  ;;  %v241_v15 = vmul.f32 0.0009698463, %v3496_v25 }
 0x2d6   :  { %2889 = vmatprep.subr.bf16.mxu0 %v2987_v3  ;;  %2731 = vmatprep.mubr.msk.f32.mxu0 %vm2988_vm2, %v2989_v34  ;;  %v277_v26 = vmul.f32 0.9990302, %v265_v17  ;;  %2427 = vst.msk [vmem:[%s4282_s13 + $0x68] sm:$0xff] %vm313_vm3, %v302_v56 }
 0x2d7   :  { %v1263_v38 = vpop.f32.mrb[10].mxu0 }
 0x2d8   :  { %v1264_v16 = vadd.f32 %v1263_v38, %v1113_v37  ;;  %v2689_v49 = vpop.f32.mrb[11].mxu0  ;;  %v301_v51 = vadd.f32 %v289_v35, %v277_v26  ;;  %v238_v37 = vmul.f32 0.9990302, %v235_v14 }
 0x2d9   :  { %v1336_v20 = vpop.f32.mrb[10].mxu1  ;;  %2891 = vmatpush3.bf16.msra.mxu0 %v2890_v46  ;;  %v242_v49 = vmul.f32 0.0009698463, %v3580_v2  ;;  %v295_v2 = vmul.f32 0.0009698463, %v3528_v36 }
 0x2da   :  { %v1337_v55 = vadd.f32 %v1336_v20, %v1117_v23  ;;  %v2700_v43 = vpop.f32.mrb[11].mxu1  ;;  %2721 = vmatmul.mubr.msk.f32.vlgmr.msra.gmra.mrb[12].mxu1 %vm97_vm0, %v1264_v16  ;;  %2898 = vmatprep.subr.bf16.mxu0 %v2987_v3  ;;  %2426 = vst.msk [vmem:[%s4282_s13 + $0x60] sm:$0xff] %vm313_vm3, %v301_v51  ;;  %v2893_v58 = vpack.c.bf16 %v302_v56, %v301_v51  ;;  %v239_v23 = vmul.f32 0.9990302, %v236_v61 }
 0x2db   :  { %2742 = vmatprep.mubr.msk.f32.mxu1 %vm2988_vm2, %v2989_v34  ;;  %v244_v17 = vadd.f32 %v241_v15, %v238_v37 }
 0x2dc   :  { %2732 = vmatmul.mubr.msk.f32.vlgmr.msra.gmra.mrb[14].mxu0 %vm97_vm0, %v1337_v55  ;;  %2894 = vmatpush3.bf16.msra.mxu1 %v2893_v58  ;;  %v245_v26 = vadd.f32 %v242_v49, %v239_v23  ;;  %v342_v58 = vld [vmem:[%s4275_s6 + $0x3] sm:$0x1] }
 0x2dd   :  { %2753 = vmatprep.mubr.msk.f32.mxu0 %vm2988_vm2, %v2989_v34  ;;  %2895 = vmatprep.subr.bf16.mxu1 %v2987_v3  ;;  %2424 = vst.msk [vmem:[%s4281_s12 + $0x4] sm:$0x1] %vm138_vm1, %v244_v17 }
 0x2de   :  { %2425 = vst.msk [vmem:[%s4281_s12 + $0x5] sm:$0x1] %vm138_vm1, %v245_v26 }
 0x2e1   :  { %v267_v59 = vld [vmem:[%s4274_s5 + $0x70] sm:$0xff]  ;;  %v268_v62 = vld [vmem:[%s4274_s5 + $0x78] sm:$0xff]  ;;  %v269_v8 = vld [vmem:[%s4274_s5 + $0x80] sm:$0xff] }
 0x2e2   :  { %v279_v46 = vmul.f32 0.9990302, %v267_v59  ;;  %v280_v47 = vmul.f32 0.9990302, %v268_v62  ;;  %v270_v24 = vld [vmem:[%s4274_s5 + $0x88] sm:$0xff]  ;;  %v273_v41 = vld [vmem:[%s4274_s5 + $0xa0] sm:$0xff] }
 0x2e3   :  { %v281_v28 = vmul.f32 0.9990302, %v269_v8  ;;  %v282_v29 = vmul.f32 0.9990302, %v270_v24  ;;  %v285_v54 = vmul.f32 0.9990302, %v273_v41 }
 0x2e4   :  { %v303_v40 = vadd.f32 %v291_v18, %v279_v46  ;;  %v304_v63 = vadd.f32 %v292_v22, %v280_v47  ;;  %v348_v59 = vmul.f32 0.0009698463, %v3682_v33  ;;  %v345_v62 = vmul.f32 0.9990302, %v342_v58 }
 0x2e5   :  { %v305_v44 = vadd.f32 %v293_v27, %v281_v28  ;;  %v306_v60 = vadd.f32 %v294_v5, %v282_v29  ;;  %v4004_v50 = vadd.f32 %v297_v12, %v285_v54  ;;  %v1350_v27 = vrot.slane %v244_v17, %v3464_v1  ;;  %v1838_v5 = vld [vmem:[%s4276_s7] sm:$0xff]  ;;  %v1841_v12 = vld [vmem:[%s4276_s7 + $0x18] sm:$0xff]  ;;  %v1847_v17 = vld [vmem:[%s4276_s7 + $0x48] sm:$0xff] }
 0x2e6   :  { %2428 = vst.msk [vmem:[%s4282_s13 + $0x70] sm:$0xff] %vm313_vm3, %v303_v40  ;;  %2429 = vst.msk [vmem:[%s4282_s13 + $0x78] sm:$0xff] %vm313_vm3, %v304_v63  ;;  %v2896_v4 = vpack.c.bf16 %v304_v63, %v303_v40  ;;  %v4071_v46 = vadd.f32 %v348_v59, %v345_v62  ;;  %v1346_v63 = vrot.slane %v3944_v57, %v3464_v1  ;;  %v1839_v57 = vld [vmem:[%s4276_s7 + $0x8] sm:$0xff] }
 0x2e7   :  { %v2899_v16 = vpack.c.bf16 %v306_v60, %v305_v44 }
 0x2e8   :  { %2897 = vmatpush3.bf16.msra.mxu1 %v2896_v4  ;;  %2438 = vst.msk [vmem:[%s4283_s14 + $0x3] sm:$0x1] %vm354_vm4, %v4071_v46  ;;  %v1354_v4 = vrot.slane %v245_v26, %v3464_v1  ;;  %v349_v26 = vmul.f32 0.0009698463, %v3751_v11 }
 0x2e9   :  { %2904 = vmatprep.subr.bf16.mxu1 %v2987_v3  ;;  %2900 = vmatpush3.bf16.msra.mxu0 %v2899_v16  ;;  %v1845_v16 = vld [vmem:[%s4276_s7 + $0x38] sm:$0xff] }
 0x2ea   :  { %2901 = vmatprep.subr.bf16.mxu0 %v2987_v3 }
 0x2ed   :  { %v274_v9 = vld [vmem:[%s4274_s5 + $0xa8] sm:$0xff] }
 0x2ee   :  { %v286_v10 = vmul.f32 0.9990302, %v274_v9  ;;  %2430 = vst.msk [vmem:[%s4282_s13 + $0x80] sm:$0xff] %vm313_vm3, %v305_v44 }
 0x2f0   :  { %v4006_v52 = vadd.f32 %v298_v32, %v286_v10  ;;  %v1840_v10 = vld [vmem:[%s4276_s7 + $0x10] sm:$0xff] }
 0x2f1   :  { %v2914_v23 = vpack.c.bf16 %v1841_v12, %v1840_v10 }
 0x2f2   :  { %v2905_v43 = vpack.c.bf16 %v4006_v52, %v4004_v50 }
 0x2f5   :  { %v271_v25 = vld [vmem:[%s4274_s5 + $0x90] sm:$0xff]  ;;  %v272_v38 = vld [vmem:[%s4274_s5 + $0x98] sm:$0xff] }
 0x2f6   :  { %2431 = vst.msk [vmem:[%s4282_s13 + $0x88] sm:$0xff] %vm313_vm3, %v306_v60  ;;  %v283_v20 = vmul.f32 0.9990302, %v271_v25  ;;  %v284_v55 = vmul.f32 0.9990302, %v272_v38  ;;  %2434 = vst.msk [vmem:[%s4282_s13 + $0xa0] sm:$0xff] %vm313_vm3, %v4004_v50  ;;  %v2911_v60 = vpack.c.bf16 %v1839_v57, %v1838_v5 }
 0x2f7   :  { %2435 = vst.msk [vmem:[%s4282_s13 + $0xa8] sm:$0xff] %vm313_vm3, %v4006_v52  ;;  %v1842_v50 = vld [vmem:[%s4276_s7 + $0x20] sm:$0xff]  ;;  %v1843_v52 = vld [vmem:[%s4276_s7 + $0x28] sm:$0xff]  ;;  %v1844_v38 = vld [vmem:[%s4276_s7 + $0x30] sm:$0xff] }
 0x2f8   :  { %v307_v36 = vadd.f32 %v295_v2, %v283_v20  ;;  %v308_v39 = vadd.f32 %v296_v21, %v284_v55  ;;  %v2917_v20 = vpack.c.bf16 %v1843_v52, %v1842_v50  ;;  %v2920_v21 = vpack.c.bf16 %v1845_v16, %v1844_v38 }
 0x2fa   :  { %v2902_v6 = vpack.c.bf16 %v308_v39, %v307_v36 }
 0x2fc   :  { %2903 = vmatpush3.bf16.msra.mxu0 %v2902_v6 }
 0x2fd   :  { %2910 = vmatprep.subr.bf16.mxu0 %v2987_v3 }
 0x2fe   :  { %v275_v35 = vld [vmem:[%s4274_s5 + $0xb0] sm:$0xff]  ;;  %v276_v30 = vld [vmem:[%s4274_s5 + $0xb8] sm:$0xff] }
 0x2ff   :  { %v287_v31 = vmul.f32 0.9990302, %v275_v35  ;;  %v288_v45 = vmul.f32 0.9990302, %v276_v30  ;;  %2432 = vst.msk [vmem:[%s4282_s13 + $0x90] sm:$0xff] %vm313_vm3, %v307_v36  ;;  %2433 = vst.msk [vmem:[%s4282_s13 + $0x98] sm:$0xff] %vm313_vm3, %v308_v39  ;;  %v1586_v36 = vrot.slane %v4071_v46, %v3464_v1 }
 0x301   :  { %v311_v51 = vadd.f32 %v299_v42, %v287_v31  ;;  %v312_v56 = vadd.f32 %v300_v48, %v288_v45 }
 0x303   :  { %2436 = vst.msk [vmem:[%s4282_s13 + $0xb0] sm:$0xff] %vm313_vm3, %v311_v51  ;;  %2437 = vst.msk [vmem:[%s4282_s13 + $0xb8] sm:$0xff] %vm313_vm3, %v312_v56  ;;  %v2908_v7 = vpack.c.bf16 %v312_v56, %v311_v51 }
 0x335   :  { %v1087_v47 = vpop.xlane.xlu0 %1086 }
 0x336   :  { %v1094_v22 = vmax.f32 %v1087_v47, 1e-24 }
 0x338   :  { %2933 = vrsqrt.f32 %v1094_v22 }
 0x342   :  { %v2934_v37 = vpop.eup %2933 }
 0x343   :  { %v4116_v55 = vmul.f32 %v2934_v37, %v3900_v19 }
 0x35c   :  { %v1090_v18 = vpop.xlane.xlu0 %1089 }
 0x35d   :  { %v1095_v8 = vmax.f32 %v1090_v18, 1e-24 }
 0x35f   :  { %2935 = vrsqrt.f32 %v1095_v8 }
 0x362   :  { %v1093_v40 = vpop.xlane.xlu1 %1092 }
 0x363   :  { %v1096_v24 = vmax.f32 %v1093_v40, 1e-24 }
 0x365   :  { %2937 = vrsqrt.f32 %v1096_v24 }
 0x369   :  { %v2936_v49 = vpop.eup %2935 }
 0x36a   :  { %v4130_v19 = vmul.f32 %v2936_v49, %v3902_v0  ;;  %v344_v0 = vld [vmem:[%s4275_s6 + $0x5] sm:$0x1] }
 0x36b   :  { %v347_v31 = vmul.f32 0.9990302, %v344_v0 }
 0x36f   :  { %v2938_v2 = vpop.eup %2937 }
 0x370   :  { %v4138_v30 = vmul.f32 %v2938_v2, %v3913_v53 }
 0x3a7   :  { %v1427_v33 = vpop.f32.mrb[12].mxu0 }
 0x3a8   :  { %v1428_v41 = vadd.f32 %v1427_v33, %v1346_v63  ;;  %v2711_v28 = vpop.f32.mrb[13].mxu0 }
 0x3aa   :  { %v1577_v29 = vmax.f32 %v1428_v41, 0.0 }
 0x3ac   :  { %2743 = vmatmul.mubr.msk.f32.vlgmr.msra.gmra.mrb[14].mxu1 %vm97_vm0, %v1577_v29 }
 0x3ad   :  { %2906 = vmatpush3.bf16.msra.mxu1 %v2905_v43  ;;  %v1500_v9 = vpop.f32.mrb[12].mxu1  ;;  %2764 = vmatprep.mubr.msk.f32.mxu1 %vm2988_vm2, %v2989_v34  ;;  %v1846_v43 = vld [vmem:[%s4276_s7 + $0x40] sm:$0xff] }
 0x3ae   :  { %v1501_v54 = vadd.f32 %v1500_v9, %v1350_v27  ;;  %v2722_v44 = vpop.f32.mrb[13].mxu1  ;;  %2907 = vmatprep.subr.bf16.mxu1 %v2987_v3  ;;  %v2923_v35 = vpack.c.bf16 %v1847_v17, %v1846_v43 }
 0x3af   :  { %v1573_v32 = vpop.f32.mrb[14].mxu0 }
 0x3b0   :  { %v1578_v14 = vmax.f32 %v1501_v54, 0.0  ;;  %v1574_v15 = vadd.f32 %v1573_v32, %v1354_v4  ;;  %v2733_v61 = vpop.f32.mrb[15].mxu0 }
 0x3b1   :  { %2909 = vmatpush3.bf16.msra.mxu1 %v2908_v7 }
 0x3b2   :  { %v1579_v25 = vmax.f32 %v1574_v15, 0.0  ;;  %2754 = vmatmul.mubr.msk.f32.vlgmr.msra.gmra.mrb[16].mxu0 %vm97_vm0, %v1578_v14  ;;  %2913 = vmatprep.subr.bf16.mxu1 %v2987_v3 }
 0x3b3   :  { %2912 = vmatpush3.bf16.msra.mxu0 %v2911_v60  ;;  %2771 = vmatprep.mubr.msk.f32.mxu0 %vm2988_vm2, %v2989_v34 }
 0x3b4   :  { %2765 = vmatmul.mubr.msk.f32.vlgmr.msra.gmra.mrb[16].mxu1 %vm97_vm0, %v1579_v25  ;;  %2916 = vmatprep.subr.bf16.mxu0 %v2987_v3 }
 0x3b5   :  { %2915 = vmatpush3.bf16.msra.mxu1 %v2914_v23  ;;  %2778 = vmatprep.mubr.msk.f32.mxu1 %vm2988_vm2, %v2989_v34 }
 0x3b6   :  { %2772 = vmatmul.mubr.msk.f32.vlgmr.msra.gmra.mrb[18].mxu0 %vm313_vm3, %v4116_v55  ;;  %2919 = vmatprep.subr.bf16.mxu1 %v2987_v3 }
 0x3b7   :  { %2918 = vmatpush3.bf16.msra.mxu0 %v2917_v20  ;;  %2785 = vmatprep.mubr.msk.f32.mxu0 %vm2988_vm2, %v2989_v34 }
 0x3b8   :  { %2779 = vmatmul.mubr.msk.f32.vlgmr.msra.gmra.mrb[18].mxu1 %vm313_vm3, %v4130_v19  ;;  %2922 = vmatprep.subr.bf16.mxu0 %v2987_v3  ;;  %v343_v3 = vld [vmem:[%s4275_s6 + $0x4] sm:$0x1] }
 0x3b9   :  { %2921 = vmatpush3.bf16.msra.mxu1 %v2920_v21  ;;  %2792 = vmatprep.mubr.msk.f32.mxu1 %vm2988_vm2, %v2989_v34  ;;  %v346_v53 = vmul.f32 0.9990302, %v343_v3 }
 0x3ba   :  { %2786 = vmatmul.mubr.msk.f32.vlgmr.msra.gmra.mrb[20].mxu0 %vm313_vm3, %v4138_v30 }
 0x3bb   :  { %2924 = vmatpush3.bf16.msra.mxu0 %v2923_v35  ;;  %2799 = vmatprep.mubr.msk.f32.mxu0 %vm2988_vm2, %v2989_v34  ;;  %v350_v34 = vmul.f32 0.0009698463, %v3804_v13  ;;  %v352_v45 = vadd.f32 %v349_v26, %v346_v53 }
 0x3bc   :  { %2793 = vmatmul.mubr.msk.f32.vlgmr.msra.gmra.mrb[20].mxu1 %vm313_vm3, %v4116_v55 }
 0x3bd   :  { %v353_v42 = vadd.f32 %v350_v34, %v347_v31  ;;  %2439 = vst.msk [vmem:[%s4283_s14 + $0x4] sm:$0x1] %vm354_vm4, %v352_v45  ;;  %v1590_v13 = vrot.slane %v352_v45, %v3464_v1 }
 0x3be   :  { %2800 = vmatmul.mubr.msk.f32.vlgmr.msra.gmra.mrb[22].mxu0 %vm313_vm3, %v4130_v19 }
 0x3bf   :  { %2440 = vst.msk [vmem:[%s4283_s14 + $0x5] sm:$0x1] %vm354_vm4, %v353_v42  ;;  %v1594_v56 = vrot.slane %v353_v42, %v3464_v1 }
 0x47f   :  { %v1667_v39 = vpop.f32.mrb[14].mxu1 }
 0x480   :  { %v1668_v11 = vadd.f32 %v1667_v39, %v1586_v36  ;;  %v2744_v48 = vpop.f32.mrb[15].mxu1 }
 0x482   :  { %v1817_v51 = vmul.f32 %v1668_v11, %v1668_v11 }
 0x484   :  { %v1820_v6 = vsel %vm313_vm3, %v1817_v51, 0.0 }
 0x485   :  { %1821 = vadd.xlane.f32.xlu1 %v1820_v6  ;;  %v1740_v7 = vpop.f32.mrb[16].mxu0 }
 0x486   :  { %v1741_v58 = vadd.f32 %v1740_v7, %v1590_v13  ;;  %v2755_v59 = vpop.f32.mrb[17].mxu0 }
 0x487   :  { %v1813_v62 = vpop.f32.mrb[16].mxu1 }
 0x488   :  { %v1814_v47 = vadd.f32 %v1813_v62, %v1594_v56  ;;  %v2766_v18 = vpop.f32.mrb[17].mxu1  ;;  %v1818_v22 = vmul.f32 %v1741_v58, %v1741_v58 }
 0x489   :  { %v1932_v40 = vpop.f32.mrb[18].mxu0 }
 0x48a   :  { %v2773_v46 = vpop.f32.mrb[19].mxu0  ;;  %v1823_v63 = vsel %vm313_vm3, %v1818_v22, 0.0  ;;  %v1819_v8 = vmul.f32 %v1814_v47, %v1814_v47  ;;  %v2082_v33 = vmul.f32 14.285714, %v1932_v40 }
 0x48b   :  { %v2005_v24 = vpop.f32.mrb[18].mxu1  ;;  %1824 = vadd.xlane.f32.xlu0 %v1823_v63 }
 0x48c   :  { %v4173_v41 = vmul.f32 14.285714, %v2005_v24  ;;  %v2780_v1 = vpop.f32.mrb[19].mxu1  ;;  %v1826_v28 = vsel %vm313_vm3, %v1819_v8, 0.0  ;;  %v2086_v54 = vsel %vm2085_vm5, %v2082_v33, -inf }
 0x48d   :  { %1827 = vadd.xlane.f32.xlu1 %v1826_v28  ;;  %v2078_v29 = vpop.f32.mrb[20].mxu0 }
 0x48e   :  { %v2787_v27 = vpop.f32.mrb[21].mxu0  ;;  %v2089_v4 = vsel %vm2085_vm5, %v4173_v41, -inf  ;;  %v4178_v57 = vmul.f32 14.285714, %v2078_v29 }
 0x48f   :  { %v2231_v5 = vpop.f32.mrb[20].mxu1  ;;  %2090 = vmax.xlane.f32.xlu0 %v2089_v4 }
 0x490   :  { %v2794_v9 = vpop.f32.mrb[21].mxu1  ;;  %v2092_v12 = vsel %vm2085_vm5, %v4178_v57, -inf  ;;  %v2305_v26 = vmul.f32 14.285714, %v2231_v5 }
 0x491   :  { %2087 = vmax.xlane.f32.xlu1 %v2086_v54  ;;  %v2301_v44 = vpop.f32.mrb[22].mxu0 }
 0x492   :  { %v2801_v10 = vpop.f32.mrb[23].mxu0  ;;  %v2306_v0 = vmul.f32 14.285714, %v2301_v44 }
 0x494   :  { %v2310_v34 = vsel %vm2085_vm5, %v2306_v0, -inf }
 0x495   :  { %2093 = vmax.xlane.f32.xlu1 %v2092_v12 }
 0x512   :  { %v1822_v32 = vpop.xlane.xlu1 %1821 }
 0x513   :  { %v1829_v60 = vmax.f32 %v1822_v32, 1e-24 }
 0x515   :  { %2939 = vrsqrt.f32 %v1829_v60 }
 0x518   :  { %v1825_v14 = vpop.xlane.xlu0 %1824 }
 0x519   :  { %v1830_v15 = vmax.f32 %v1825_v14, 1e-24 }
 0x51a   :  { %v1828_v61 = vpop.xlane.xlu1 %1827 }
 0x51b   :  { %2941 = vrsqrt.f32 %v1830_v15  ;;  %v1831_v50 = vmax.f32 %v1828_v61, 1e-24 }
 0x51c   :  { %v2091_v45 = vpop.xlane.xlu0 %2090 }
 0x51d   :  { %2943 = vrsqrt.f32 %v1831_v50 }
 0x51f   :  { %v2940_v52 = vpop.eup %2939 }
 0x520   :  { %v1835_v37 = vmul.f32 %v2940_v52, %v1668_v11 }
 0x522   :  { %v1848_v23 = vmul.f32 %v1835_v37, %v4116_v55 }
 0x524   :  { %v1851_v25 = vsel %vm313_vm3, %v1848_v23, 0.0 }
 0x525   :  { %v2942_v38 = vpop.eup %2941  ;;  %1852 = vadd.xlane.f32.xlu0 %v1851_v25 }
 0x526   :  { %v1836_v16 = vmul.f32 %v2942_v38, %v1741_v58 }
 0x527   :  { %v2944_v49 = vpop.eup %2943 }
 0x528   :  { %v1849_v20 = vmul.f32 %v1836_v16, %v4130_v19  ;;  %v1837_v43 = vmul.f32 %v2944_v49, %v1814_v47  ;;  %v2155_v21 = vmul.f32 %v1836_v16, %v4116_v55  ;;  %v2088_v55 = vpop.xlane.xlu1 %2087 }
 0x52a   :  { %v1854_v17 = vsel %vm313_vm3, %v1849_v20, 0.0  ;;  %v1850_v2 = vmul.f32 %v1837_v43, %v4138_v30  ;;  %v2156_v3 = vmul.f32 %v1837_v43, %v4130_v19  ;;  %v2157_v53 = vsel %vm313_vm3, %v2155_v21, 0.0 }
 0x52b   :  { %1855 = vadd.xlane.f32.xlu1 %v1854_v17  ;;  %v2307_v30 = vsel %vm2085_vm5, %v2305_v26, -inf }
 0x52c   :  { %v1857_v35 = vsel %vm313_vm3, %v1850_v2, 0.0  ;;  %v2160_v31 = vsel %vm313_vm3, %v2156_v3, 0.0  ;;  %v2094_v19 = vpop.xlane.xlu1 %2093 }
 0x52d   :  { %1858 = vadd.xlane.f32.xlu0 %v1857_v35 }
 0x52f   :  { %2158 = vadd.xlane.f32.xlu1 %v2157_v53 }
 0x531   :  { %2161 = vadd.xlane.f32.xlu0 %v2160_v31 }
 0x533   :  { %2311 = vmax.xlane.f32.xlu1 %v2310_v34 }
 0x535   :  { %2308 = vmax.xlane.f32.xlu0 %v2307_v30 }
 0x5b2   :  { %v1853_v42 = vpop.xlane.xlu0 %1852 }
 0x5b3   :  { %v4195_v36 = vmul.f32 14.285714, %v1853_v42 }
 0x5b5   :  { %v4198_v39 = vmax.f32 %v4195_v36, %v2088_v55 }
 0x5b7   :  { %v2107_v11 = vsub.f32 %v2082_v33, %v4198_v39  ;;  %v2098_v14 = vsub.f32 %v4195_v36, %v4198_v39 }
 0x5b8   :  { %v1856_v48 = vpop.xlane.xlu1 %1855 }
 0x5b9   :  { %v2110_v51 = vmul.f32 1.442695, %v2107_v11  ;;  %v4201_v13 = vmul.f32 14.285714, %v1856_v48  ;;  %v2101_v15 = vmul.f32 1.442695, %v2098_v14 }
 0x5ba   :  { %v1859_v6 = vpop.xlane.xlu0 %1858 }
 0x5bb   :  { %v4204_v56 = vmax.f32 %v4201_v13, %v2091_v45  ;;  %v4206_v7 = vmul.f32 14.285714, %v1859_v6  ;;  %2945 = vpow2.f32 %v2110_v51 }
 0x5bc   :  { %v2159_v58 = vpop.xlane.xlu1 %2158 }
 0x5bd   :  { %v2108_v59 = vsub.f32 %v4173_v41, %v4204_v56  ;;  %v4211_v62 = vmax.f32 %v4206_v7, %v2094_v19  ;;  %v4217_v8 = vmul.f32 14.285714, %v2159_v58  ;;  %v2099_v61 = vsub.f32 %v4201_v13, %v4204_v56 }
 0x5be   :  { %v2162_v47 = vpop.xlane.xlu0 %2161 }
 0x5bf   :  { %v2112_v18 = vmul.f32 1.442695, %v2108_v59  ;;  %v2109_v22 = vsub.f32 %v4178_v57, %v4211_v62  ;;  %v4215_v40 = vmul.f32 14.285714, %v2162_v47  ;;  %v2100_v50 = vsub.f32 %v4206_v7, %v4211_v62 }
 0x5c0   :  { %v2312_v46 = vpop.xlane.xlu1 %2311  ;;  %v2103_v52 = vmul.f32 1.442695, %v2099_v61 }
 0x5c1   :  { %v2114_v63 = vmul.f32 1.442695, %v2109_v22  ;;  %2947 = vpow2.f32 %v2112_v18  ;;  %v4220_v24 = vmax.f32 %v4215_v40, %v2312_v46  ;;  %v2105_v37 = vmul.f32 1.442695, %v2100_v50 }
 0x5c2   :  { %v2309_v33 = vpop.xlane.xlu0 %2308 }
 0x5c3   :  { %v4223_v41 = vmax.f32 %v4217_v8, %v2309_v33  ;;  %2949 = vpow2.f32 %v2114_v63  ;;  %v2322_v1 = vsub.f32 %v2306_v0, %v4220_v24  ;;  %v2316_v23 = vsub.f32 %v4215_v40, %v4220_v24 }
 0x5c5   :  { %v2321_v28 = vsub.f32 %v2305_v26, %v4223_v41  ;;  %v2946_v29 = vpop.eup %2945  ;;  %v2325_v27 = vmul.f32 1.442695, %v2322_v1  ;;  %v2315_v25 = vsub.f32 %v4217_v8, %v4223_v41  ;;  %v2319_v38 = vmul.f32 1.442695, %v2316_v23 }
 0x5c6   :  { %v2116_v5 = vsel %vm2085_vm5, %v2946_v29, 0.0 }
 0x5c7   :  { %v2323_v4 = vmul.f32 1.442695, %v2321_v28  ;;  %2117 = vadd.xlane.f32.xlu0 %v2116_v5  ;;  %2951 = vpow2.f32 %v2325_v27  ;;  %v2317_v20 = vmul.f32 1.442695, %v2315_v25 }
 0x5c9   :  { %2953 = vpow2.f32 %v2323_v4 }
 0x5ca   :  { %2955 = vpow2.f32 %v2101_v15 }
 0x5cb   :  { %v2948_v57 = vpop.eup %2947  ;;  %2957 = vpow2.f32 %v2103_v52 }
 0x5cc   :  { %v2119_v9 = vsel %vm2085_vm5, %v2948_v57, 0.0  ;;  %2959 = vpow2.f32 %v2105_v37 }
 0x5cd   :  { %v2950_v54 = vpop.eup %2949  ;;  %2120 = vadd.xlane.f32.xlu1 %v2119_v9  ;;  %2961 = vpow2.f32 %v2319_v38 }
 0x5ce   :  { %v2122_v44 = vsel %vm2085_vm5, %v2950_v54, 0.0 }
 0x5cf   :  { %2123 = vadd.xlane.f32.xlu0 %v2122_v44 }
 0x5d1   :  { %v2952_v10 = vpop.eup %2951 }
 0x5d2   :  { %v2330_v12 = vsel %vm2085_vm5, %v2952_v10, 0.0 }
 0x5d3   :  { %v2954_v32 = vpop.eup %2953  ;;  %2331 = vadd.xlane.f32.xlu0 %v2330_v12 }
 0x5d4   :  { %v2327_v60 = vsel %vm2085_vm5, %v2954_v32, 0.0  ;;  %v2956_v16 = vpop.eup %2955 }
 0x5d5   :  { %2328 = vadd.xlane.f32.xlu1 %v2327_v60  ;;  %v2958_v17 = vpop.eup %2957 }
 0x5d6   :  { %v2960_v35 = vpop.eup %2959 }
 0x5d7   :  { %v2962_v53 = vpop.eup %2961 }
 0x654   :  { %v2118_v49 = vpop.xlane.xlu0 %2117 }
 0x655   :  { %v2125_v43 = vadd.f32 %v2956_v16, %v2118_v49 }
 0x657   :  { %2963 = vlog2.f32 %v2125_v43 }
 0x658   :  { %2965 = vpow2.f32 %v2317_v20 }
 0x65a   :  { %v2121_v2 = vpop.xlane.xlu1 %2120 }
 0x65b   :  { %v2126_v21 = vadd.f32 %v2958_v17, %v2121_v2 }
 0x65c   :  { %v2124_v3 = vpop.xlane.xlu0 %2123 }
 0x65d   :  { %2967 = vlog2.f32 %v2126_v21  ;;  %v2127_v0 = vadd.f32 %v2960_v35, %v2124_v3 }
 0x65f   :  { %2969 = vlog2.f32 %v2127_v0 }
 0x660   :  { %v2332_v31 = vpop.xlane.xlu0 %2331 }
 0x661   :  { %v2964_v26 = vpop.eup %2963  ;;  %v2334_v30 = vadd.f32 %v2962_v53, %v2332_v31 }
 0x662   :  { %v2129_v34 = vmul.f32 0.6931472, %v2964_v26  ;;  %v2966_v55 = vpop.eup %2965  ;;  %v2329_v45 = vpop.xlane.xlu1 %2328 }
 0x663   :  { %v2333_v42 = vadd.f32 %v2966_v55, %v2329_v45  ;;  %2971 = vlog2.f32 %v2334_v30 }
 0x664   :  { %v2134_v19 = vadd.f32 %v2129_v34, %v4198_v39 }
 0x665   :  { %2973 = vlog2.f32 %v2333_v42 }
 0x666   :  { %v2137_v59 = vsub.f32 %v2134_v19, %v4195_v36 }
 0x667   :  { %v2968_v11 = vpop.eup %2967 }
 0x668   :  { %v2131_v48 = vmul.f32 0.6931472, %v2968_v11  ;;  %v2141_v63 = vsel %vm2140_vm6, %v2137_v59, 0.0 }
 0x669   :  { %v2970_v51 = vpop.eup %2969 }
 0x66a   :  { %v2135_v6 = vadd.f32 %v2131_v48, %v4204_v56  ;;  %v2133_v58 = vmul.f32 0.6931472, %v2970_v51 }
 0x66c   :  { %v2136_v47 = vadd.f32 %v2133_v58, %v4211_v62  ;;  %v2138_v18 = vsub.f32 %v2135_v6, %v4201_v13 }
 0x66d   :  { %v2972_v22 = vpop.eup %2971 }
 0x66e   :  { %v2139_v46 = vsub.f32 %v2136_v47, %v4206_v7  ;;  %v2142_v39 = vsel %vm2140_vm6, %v2138_v18, 0.0  ;;  %v2338_v33 = vmul.f32 0.6931472, %v2972_v22 }
 0x66f   :  { %v2143_v1 = vadd.f32 %v2142_v39, %v2141_v63  ;;  %v2974_v28 = vpop.eup %2973 }
 0x670   :  { %v2144_v56 = vsel %vm2140_vm6, %v2139_v46, 0.0  ;;  %v2336_v29 = vmul.f32 0.6931472, %v2974_v28  ;;  %v2340_v36 = vadd.f32 %v2338_v33, %v4220_v24 }
 0x671   :  { %v2145_v27 = vadd.f32 %v2144_v56, %v2143_v1 }
 0x672   :  { %v2339_v62 = vadd.f32 %v2336_v29, %v4223_v41  ;;  %v2342_v13 = vsub.f32 %v2340_v36, %v4215_v40 }
 0x673   :  { %2146 = vadd.xlane.f32.xlu1 %v2145_v27 }
 0x674   :  { %v2341_v7 = vsub.f32 %v2339_v62, %v4217_v8  ;;  %v2344_v4 = vsel %vm2140_vm6, %v2342_v13, 0.0 }
 0x676   :  { %v2343_v5 = vsel %vm2140_vm6, %v2341_v7, 0.0 }
 0x677   :  { %v2345_v57 = vadd.f32 %v2344_v4, %v2343_v5 }
 0x679   :  { %2346 = vadd.xlane.f32.xlu0 %v2345_v57 }
 0x700   :  { %v2147_v9 = vpop.xlane.xlu1 %2146 }
 0x701   :  { %v2148_v54 = vrot.slane %v2147_v9, 4 }
 0x703   :  { %v2149_v44 = vadd.f32 %v2148_v54, %v2147_v9 }
 0x705   :  { %v2150_v10 = vrot.slane %v2149_v44, 2 }
 0x706   :  { %v2347_v12 = vpop.xlane.xlu0 %2346 }
 0x707   :  { %v2151_v24 = vadd.f32 %v2150_v10, %v2149_v44  ;;  %v2348_v32 = vrot.slane %v2347_v12, 4 }
 0x709   :  { %v2152_v60 = vrot.slane %v2151_v24, 1  ;;  %v2349_v41 = vadd.f32 %v2348_v32, %v2347_v12 }
 0x70b   :  { %v2153_v14 = vadd.f32 %v2152_v60, %v2151_v24  ;;  %v2350_v15 = vrot.slane %v2349_v41, 2 }
 0x70d   :  { %2925 = vpush %v2153_v14  ;;  %v2351_v40 = vadd.f32 %v2350_v15, %v2349_v41 }
 0x70f   :  { %v2352_v8 = vrot.slane %v2351_v40, 1 }
 0x711   :  { %v2353_v61 = vadd.f32 %v2352_v8, %v2351_v40 }
 0x713   :  { %2927 = vpush %v2353_v61 }
 0x73e   :  { %s2926_s6 = spop %2925 }
 0x744   :  { %s2928_s14 = spop %2927 }
 0x745   :  { %s2355_s13 = sadd.f32 %s2928_s14, %s2926_s6 }
 0x747   :  { %s2356_s4 = smul.f32 0.125, %s2355_s13 }
 0x749   :  { %2358 = sst [smem:[#allocation2]] %s2356_s4 }
 0x74a   :  { %2984 = shalt.err (!%p2981_p2)
}
 0x74b   :  { %s2990_s24 = smov [#allocation2]  }
 0x74c   :  { %2366 = dma.smem_to_hbm %s2990_s24, 16, %s4277_s8, [#allocation3]  }
 0x74d   :  { %2985 = dma.done.wait [#allocation3], 16  }
 0x74e   :  { %2986 = vsyncadd [#allocation3], 4294967280 }
 0x74f   :  { %2394 = sfence }
 0x750   :  { %2395 = vsyncpa [#allocation3], 1 }

</bundles_post_ra>
